<compile_context>
chip_gen: v7x
topology: tpu7x:2x2x1
jax: 0.10.0
libtpu: 0.0.40
codegen_flags: <defaults>
</compile_context>

<pallas_src>
import math
import functools

import jax
import jax.numpy as jnp
from jax.experimental import pallas as pl
from jax.experimental.pallas import tpu as pltpu


# ---------------------------------------------------------------- helpers ---

def _layernorm(x, g, b, eps=1e-6):
    # Matches reference LayerNorm exactly: torch.std is unbiased (N-1) and
    # eps is added to std (not variance).  All math in f32.
    mean = jnp.mean(x, axis=-1, keepdims=True)
    d = x - mean
    var = jnp.sum(d * d, axis=-1, keepdims=True) * (1.0 / (x.shape[-1] - 1))
    std = jnp.sqrt(var)
    inv = pl.reciprocal(std + eps, approx=True)
    return g * d * inv + b


def _gelu(x):
    # Reference GELU (tanh approximation).
    return 0.5 * x * (1.0 + jnp.tanh(math.sqrt(2.0 / math.pi)
                                     * (x + 0.044715 * x ** 3)))


# ---------------------------------------------------------------- kernel ----

def bert_layer_kernel(x_ref, mask_ref,
                      ln1g_ref, ln1b_ref,
                      wq_ref, bq_ref, wk_ref, bk_ref, wv_ref, bv_ref,
                      wo_ref, bo_ref,
                      ln2g_ref, ln2b_ref,
                      w1_ref, b1_ref, w2_ref, b2_ref,
                      out_ref,
                      acc_ref, ctx_ref,
                      *, num_heads, d_k, b_blk, seq):
    """One grid step = one (batch block, layer).  acc_ref holds the resident
    (b_blk*seq, H) f32 activation slab across the layer axis; ctx_ref is a
    (b_blk*seq, H) bf16 slab that collects all heads' context vectors so the
    output projection is a single full-K matmul."""
    layer = pl.program_id(1)
    BS = b_blk * seq
    H = num_heads * d_k

    # Layer 0: load this batch block's embeddings into the resident slab.
    @pl.when(layer == 0)
    def _():
        acc_ref[...] = x_ref[...].reshape(BS, H).astype(jnp.float32)

    x = acc_ref[...]                                       # (BS, H) f32
    # key-padding mask (True where key token id > 0), broadcast over queries
    maskb = (mask_ref[...] > 0.0).reshape(b_blk, 1, seq)   # (b, 1, S)

    # ---- sublayer 1: multi-head self-attention on LayerNorm(x) -------------
    # (1/sqrt(d_k) is folded into wq/bq at parameter-init time.)
    xn = _layernorm(x, ln1g_ref[...], ln1b_ref[...]).astype(jnp.bfloat16)
    q = (jnp.dot(xn, wq_ref[...], preferred_element_type=jnp.float32)
         + bq_ref[...]).astype(jnp.bfloat16)
    k = (jnp.dot(xn, wk_ref[...], preferred_element_type=jnp.float32)
         + bk_ref[...]).astype(jnp.bfloat16)
    v = (jnp.dot(xn, wv_ref[...], preferred_element_type=jnp.float32)
         + bv_ref[...]).astype(jnp.bfloat16)

    for h in range(num_heads):                 # static, small head count
        sl = slice(h * d_k, (h + 1) * d_k)
        qh = q[:, sl].reshape(b_blk, seq, d_k)
        kh = k[:, sl].reshape(b_blk, seq, d_k)
        vh = v[:, sl].reshape(b_blk, seq, d_k)
        # batched over the batch block, contraction over d_k (no explicit .T)
        scores = jnp.einsum('bqd,bkd->bqk', qh, kh,
                            preferred_element_type=jnp.float32)   # (b,S,S)
        scores = jnp.where(maskb, scores, -1e9)          # mask padding keys
        scores = scores - jnp.max(scores, axis=-1, keepdims=True)
        e = jnp.exp(scores)
        p = e * pl.reciprocal(jnp.sum(e, axis=-1, keepdims=True), approx=True)
        ctx = jnp.einsum('bqk,bkd->bqd', p.astype(jnp.bfloat16), vh,
                         preferred_element_type=jnp.float32)      # (b,S,dk)
        # stash this head's context in the bf16 slab (bounds live ranges)
        ctx_ref[:, sl] = ctx.reshape(BS, d_k).astype(jnp.bfloat16)

    # single full-K output projection (K = H, not d_k)
    attn = (jnp.dot(ctx_ref[...], wo_ref[...],
                    preferred_element_type=jnp.float32) + bo_ref[...])
    x1 = x + attn                                          # residual 1

    # ---- sublayer 2: feed-forward on LayerNorm(x1) --------------------------
    xn2 = _layernorm(x1, ln2g_ref[...], ln2b_ref[...]).astype(jnp.bfloat16)
    h1 = jnp.dot(xn2, w1_ref[...], preferred_element_type=jnp.float32) + b1_ref[...]
    h1 = _gelu(h1)
    ff = jnp.dot(h1.astype(jnp.bfloat16), w2_ref[...],
                 preferred_element_type=jnp.float32) + b2_ref[...]
    x_new = x1 + ff                                        # residual 2

    acc_ref[...] = x_new                                   # carry to next layer

    @pl.when(layer == pl.num_programs(1) - 1)
    def _():
        out_ref[...] = x_new.reshape(b_blk, seq, H).astype(out_ref.dtype)


# ------------------------------------------------------------ pallas call ---

def bert_encoder_stack(x, mask_f, p, num_heads):
    """x: (B, S, H) f32 embeddings, mask_f: (B, 1, S) f32 (1.0 where id > 0)."""
    B, S, H = x.shape
    L = p["wq"].shape[0]
    Fh = p["w1"].shape[-1]
    d_k = H // num_heads
    b_blk = 1                      # one batch element per grid block

    def wspec(shape):
        # Stacked per-layer tensor (L, *shape): stream one layer's slab.
        nd = len(shape)
        return pl.BlockSpec((None,) + shape,
                            lambda b, l, _nd=nd: (l,) + (0,) * _nd)

    in_specs = [
        pl.BlockSpec((b_blk, S, H), lambda b, l: (b, 0, 0)),    # x (embeddings)
        pl.BlockSpec((b_blk, 1, S), lambda b, l: (b, 0, 0)),    # key-pad mask
        wspec((1, H)), wspec((1, H)),                           # ln1 g/b
        wspec((H, H)), wspec((1, H)),                           # wq/bq (scaled)
        wspec((H, H)), wspec((1, H)),                           # wk/bk
        wspec((H, H)), wspec((1, H)),                           # wv/bv
        wspec((H, H)), wspec((1, H)),                           # wo/bo
        wspec((1, H)), wspec((1, H)),                           # ln2 g/b
        wspec((H, Fh)), wspec((1, Fh)),                         # w1/b1
        wspec((Fh, H)), wspec((1, H)),                          # w2/b2
    ]
    out_spec = pl.BlockSpec((b_blk, S, H), lambda b, l: (b, 0, 0))

    kernel = functools.partial(bert_layer_kernel, num_heads=num_heads,
                               d_k=d_k, b_blk=b_blk, seq=S)

    operands = (x.astype(jnp.float32), mask_f,
                p["ln1_g"], p["ln1_b"],
                p["wq"], p["bq"], p["wk"], p["bk"], p["wv"], p["bv"],
                p["wo"], p["bo"],
                p["ln2_g"], p["ln2_b"],
                p["w1"], p["b1"], p["w2"], p["b2"])

    out = pl.pallas_call(
        kernel,
        out_shape=jax.ShapeDtypeStruct((B, S, H), jnp.float32),
        grid_spec=pltpu.PrefetchScalarGridSpec(
            num_scalar_prefetch=0,
            grid=(B // b_blk, L),
            in_specs=in_specs,
            out_specs=out_spec,
            scratch_shapes=[
                pltpu.VMEM((b_blk * S, H), jnp.float32),   # resident activations
                pltpu.VMEM((b_blk * S, H), jnp.bfloat16),  # per-head ctx slab
            ]),
        compiler_params=pltpu.CompilerParams(
            dimension_semantics=("parallel", "arbitrary"),
            # ~56 MiB: fits double-buffered per-layer weights + activations on
            # v7x (64 MiB physical) and raises the 16/32 MiB scoped default on
            # v5e/v6e.
            vmem_limit_bytes=56 * 1024 * 1024),
    )(*operands)
    return out


# ------------------------------------------------------------ model glue ----

def pos_embedding(S, H):
    pos = jnp.arange(S, dtype=jnp.float32)[:, None]
    div = jnp.exp(jnp.arange(0, H, 2, dtype=jnp.float32)
                  * (-math.log(10000.0) / H))
    pe = jnp.zeros((S, H), jnp.float32)
    pe = pe.at[:, 0::2].set(jnp.sin(pos * div))
    pe = pe.at[:, 1::2].set(jnp.cos(pos * div))
    return pe


def init_bert_params(key, vocab, H, Fh, n_layers, n_heads):
    d_k = H // n_heads
    state = {"key": key}

    def nxt():
        state["key"], sub = jax.random.split(state["key"])
        return sub

    tok = jax.random.normal(nxt(), (vocab, H), jnp.float32) * 0.02
    tok = tok.at[0].set(0.0)                 # padding_idx=0
    seg = jax.random.normal(nxt(), (3, H), jnp.float32) * 0.02
    seg = seg.at[0].set(0.0)                 # padding_idx=0

    def stacked(shape, scale=0.05):
        return jax.random.normal(nxt(), (n_layers,) + shape, jnp.float32) * scale

    # linear weights stored (in, out) = nn.Linear weight transposed, stacked
    # on a leading layer axis; matmul weights in bf16 (f32 accumulation inside
    # the kernel), LN params / biases in f32.
    attn_scale = 1.0 / math.sqrt(d_k)        # folded into wq / bq at init
    params = {
        "tok": tok, "seg": seg,
        "ln1_g": jnp.ones((n_layers, 1, H), jnp.float32),
        "ln1_b": jnp.zeros((n_layers, 1, H), jnp.float32),
        "ln2_g": jnp.ones((n_layers, 1, H), jnp.float32),
        "ln2_b": jnp.zeros((n_layers, 1, H), jnp.float32),
        "wq": (stacked((H, H)) * attn_scale).astype(jnp.bfloat16),
        "bq": stacked((1, H)) * attn_scale,
        "wk": stacked((H, H)).astype(jnp.bfloat16), "bk": stacked((1, H)),
        "wv": stacked((H, H)).astype(jnp.bfloat16), "bv": stacked((1, H)),
        "wo": stacked((H, H)).astype(jnp.bfloat16), "bo": stacked((1, H)),
        "w1": stacked((H, Fh)).astype(jnp.bfloat16), "b1": stacked((1, Fh)),
        "w2": stacked((Fh, H)).astype(jnp.bfloat16), "b2": stacked((1, H)),
    }
    return params


def bert_forward(params, x_ids, seg_ids, num_heads):
    B, S = x_ids.shape
    H = params["tok"].shape[1]
    pe = pos_embedding(S, H)
    # BERTEmbedding: token + segment + positional (dropout = identity).
    # Embedding gathers stay in plain JAX glue outside the kernel.
    h = params["tok"][x_ids] + params["seg"][seg_ids] + pe[None]
    # key padding mask derived from token ids (broadcast over query positions)
    mask_f = (x_ids > 0).astype(jnp.float32)[:, None, :]   # (B, 1, S)
    return bert_encoder_stack(h, mask_f, params, num_heads)


# ----------------------------------------------------------------- main -----

if __name__ == "__main__":
    vocab, H = 32, 32                    # hidden = 32
    Fh = 4 * H                           # feed_forward_hidden = 4 * hidden
    n_layers, n_heads = 2, 4             # d_k = 8
    B, S = 2, 8

    key = jax.random.PRNGKey(0)
    kp, kx, ks = jax.random.split(key, 3)

    params = init_bert_params(kp, vocab, H, Fh, n_layers, n_heads)

    x_ids = jax.random.randint(kx, (B, S), 1, vocab)
    x_ids = x_ids.at[:, -2:].set(0)      # some padding tokens to exercise mask
    seg_ids = jax.random.randint(ks, (B, S), 0, 3)

    out = bert_forward(params, x_ids, seg_ids, n_heads)
    jax.block_until_ready(out)
    assert out.shape == (B, S, H)
    assert bool(jnp.all(jnp.isfinite(out)))
    print("KERNEL_OK")
</pallas_src>

<mosaic_0001>
module attributes {stable_mosaic.version = 11 : i64} {
  func.func @bert_layer_kernel(%arg0: i32, %arg1: i32, %arg2: memref<1x8x32xf32, #tpu.memory_space<vmem>>, %arg3: memref<1x1x8xf32, #tpu.memory_space<vmem>>, %arg4: memref<1x1x32xf32, #tpu.memory_space<vmem>>, %arg5: memref<1x1x32xf32, #tpu.memory_space<vmem>>, %arg6: memref<1x32x32xbf16, #tpu.memory_space<vmem>>, %arg7: memref<1x1x32xf32, #tpu.memory_space<vmem>>, %arg8: memref<1x32x32xbf16, #tpu.memory_space<vmem>>, %arg9: memref<1x1x32xf32, #tpu.memory_space<vmem>>, %arg10: memref<1x32x32xbf16, #tpu.memory_space<vmem>>, %arg11: memref<1x1x32xf32, #tpu.memory_space<vmem>>, %arg12: memref<1x32x32xbf16, #tpu.memory_space<vmem>>, %arg13: memref<1x1x32xf32, #tpu.memory_space<vmem>>, %arg14: memref<1x1x32xf32, #tpu.memory_space<vmem>>, %arg15: memref<1x1x32xf32, #tpu.memory_space<vmem>>, %arg16: memref<1x32x128xbf16, #tpu.memory_space<vmem>>, %arg17: memref<1x1x128xf32, #tpu.memory_space<vmem>>, %arg18: memref<1x128x32xbf16, #tpu.memory_space<vmem>>, %arg19: memref<1x1x32xf32, #tpu.memory_space<vmem>>, %arg20: memref<1x8x32xf32, #tpu.memory_space<vmem>>, %arg21: memref<8x32xf32, #tpu.memory_space<vmem>>, %arg22: memref<8x32xbf16, #tpu.memory_space<vmem>>) attributes {dimension_semantics = [#tpu.dimension_semantics<parallel>, #tpu.dimension_semantics<arbitrary>], iteration_bounds = array<i64: 2, 2>, scalar_prefetch = 0 : i64, scratch_operands = 2 : i64, tpu.core_type = #tpu.core_type<tc>, window_params = [{transform_indices = @transform_0, window_bounds = array<i64: 1, 8, 32>}, {transform_indices = @transform_1, window_bounds = array<i64: 1, 1, 8>}, {transform_indices = @transform_2, window_bounds = array<i64: 1, 1, 32>}, {transform_indices = @transform_3, window_bounds = array<i64: 1, 1, 32>}, {transform_indices = @transform_4, window_bounds = array<i64: 1, 32, 32>}, {transform_indices = @transform_5, window_bounds = array<i64: 1, 1, 32>}, {transform_indices = @transform_6, window_bounds = array<i64: 1, 32, 32>}, {transform_indices = @transform_7, window_bounds = array<i64: 1, 1, 32>}, {transform_indices = @transform_8, window_bounds = array<i64: 1, 32, 32>}, {transform_indices = @transform_9, window_bounds = array<i64: 1, 1, 32>}, {transform_indices = @transform_10, window_bounds = array<i64: 1, 32, 32>}, {transform_indices = @transform_11, window_bounds = array<i64: 1, 1, 32>}, {transform_indices = @transform_12, window_bounds = array<i64: 1, 1, 32>}, {transform_indices = @transform_13, window_bounds = array<i64: 1, 1, 32>}, {transform_indices = @transform_14, window_bounds = array<i64: 1, 32, 128>}, {transform_indices = @transform_15, window_bounds = array<i64: 1, 1, 128>}, {transform_indices = @transform_16, window_bounds = array<i64: 1, 128, 32>}, {transform_indices = @transform_17, window_bounds = array<i64: 1, 1, 32>}, {transform_indices = @transform_18, window_bounds = array<i64: 1, 8, 32>}]} {
    %c0_i32 = arith.constant 0 : i32
    %0 = arith.cmpi eq, %arg1, %c0_i32 : i32
    %1 = arith.extui %0 : i1 to i32
    %c0_i32_0 = arith.constant 0 : i32
    %2 = arith.cmpi ne, %1, %c0_i32_0 : i32
    scf.if %2 {
      %c0_103 = arith.constant 0 : index
      %c0_104 = arith.constant 0 : index
      %c0_105 = arith.constant 0 : index
      %229 = vector.load %arg2[%c0_103, %c0_104, %c0_105] : memref<1x8x32xf32, #tpu.memory_space<vmem>>, vector<1x8x32xf32>
      %230 = vector.shape_cast %229 : vector<1x8x32xf32> to vector<8x32xf32>
      %c0_106 = arith.constant 0 : index
      %c0_107 = arith.constant 0 : index
      %231 = vector.load %arg21[%c0_106, %c0_107] : memref<8x32xf32, #tpu.memory_space<vmem>>, vector<8x32xf32>
      tpu.vector_store %arg21[%c0_106, %c0_107], %230 {strides = array<i32>} : memref<8x32xf32, #tpu.memory_space<vmem>>, vector<8x32xf32>,
    } else {
    }
    %c0 = arith.constant 0 : index
    %c0_1 = arith.constant 0 : index
    %3 = vector.load %arg21[%c0, %c0_1] : memref<8x32xf32, #tpu.memory_space<vmem>>, vector<8x32xf32>
    %c0_2 = arith.constant 0 : index
    %c0_3 = arith.constant 0 : index
    %c0_4 = arith.constant 0 : index
    %4 = vector.load %arg3[%c0_2, %c0_3, %c0_4] : memref<1x1x8xf32, #tpu.memory_space<vmem>>, vector<1x1x8xf32>
    %cst = arith.constant 0.000000e+00 : f32
    %5 = vector.broadcast %cst : f32 to vector<1x1x8xf32>
    %6 = arith.cmpf ogt, %4, %5 : vector<1x1x8xf32>
    %c0_5 = arith.constant 0 : index
    %c0_6 = arith.constant 0 : index
    %c0_7 = arith.constant 0 : index
    %7 = vector.load %arg4[%c0_5, %c0_6, %c0_7] : memref<1x1x32xf32, #tpu.memory_space<vmem>>, vector<1x1x32xf32>
    %8 = vector.shape_cast %7 : vector<1x1x32xf32> to vector<1x32xf32>
    %c0_8 = arith.constant 0 : index
    %c0_9 = arith.constant 0 : index
    %c0_10 = arith.constant 0 : index
    %9 = vector.load %arg5[%c0_8, %c0_9, %c0_10] : memref<1x1x32xf32, #tpu.memory_space<vmem>>, vector<1x1x32xf32>
    %10 = vector.shape_cast %9 : vector<1x1x32xf32> to vector<1x32xf32>
    %cst_11 = arith.constant dense<0.000000e+00> : vector<8xf32>
    %11 = vector.multi_reduction <add>, %3, %cst_11 [1] : vector<8x32xf32> to vector<8xf32>
    %12 = vector.shape_cast %11 : vector<8xf32> to vector<8x1xf32>
    %cst_12 = arith.constant 3.200000e+01 : f32
    %13 = vector.broadcast %cst_12 : f32 to vector<8x1xf32>
    %14 = arith.divf %12, %13 : vector<8x1xf32>
    %15 = vector.broadcast %14 : vector<8x1xf32> to vector<8x32xf32>
    %16 = arith.subf %3, %15 : vector<8x32xf32>
    %17 = arith.mulf %16, %16 : vector<8x32xf32>
    %cst_13 = arith.constant dense<0.000000e+00> : vector<8xf32>
    %18 = vector.multi_reduction <add>, %17, %cst_13 [1] : vector<8x32xf32> to vector<8xf32>
    %19 = vector.shape_cast %18 : vector<8xf32> to vector<8x1xf32>
    %cst_14 = arith.constant 0.0322580636 : f32
    %20 = vector.broadcast %cst_14 : f32 to vector<8x1xf32>
    %21 = arith.mulf %19, %20 : vector<8x1xf32>
    %22 = math.sqrt %21 : vector<8x1xf32>
    %cst_15 = arith.constant 9.99999997E-7 : f32
    %23 = vector.broadcast %cst_15 : f32 to vector<8x1xf32>
    %24 = arith.addf %22, %23 : vector<8x1xf32>
    %25 = tpu.reciprocal %24 {approx = true} : vector<8x1xf32> -> vector<8x1xf32>
    %26 = vector.broadcast %8 : vector<1x32xf32> to vector<8x32xf32>
    %27 = arith.mulf %26, %16 : vector<8x32xf32>
    %28 = vector.broadcast %25 : vector<8x1xf32> to vector<8x32xf32>
    %29 = arith.mulf %27, %28 : vector<8x32xf32>
    %30 = vector.broadcast %10 : vector<1x32xf32> to vector<8x32xf32>
    %31 = arith.addf %29, %30 : vector<8x32xf32>
    %32 = arith.truncf %31 : vector<8x32xf32> to vector<8x32xbf16>
    %c0_16 = arith.constant 0 : index
    %c0_17 = arith.constant 0 : index
    %c0_18 = arith.constant 0 : index
    %33 = vector.load %arg6[%c0_16, %c0_17, %c0_18] : memref<1x32x32xbf16, #tpu.memory_space<vmem>>, vector<1x32x32xbf16>
    %34 = vector.shape_cast %33 : vector<1x32x32xbf16> to vector<32x32xbf16>
    %cst_19 = arith.constant dense<0.000000e+00> : vector<8x32xf32>
    %35 = tpu.matmul %32, %34, %cst_19 {dimension_numbers = #tpu.dot_dimension_numbers<[1], [0], [0], [1], [0, 0, 1, 1], [], []>} : vector<8x32xbf16>, vector<32x32xbf16>, vector<8x32xf32> -> vector<8x32xf32>
    %c0_20 = arith.constant 0 : index
    %c0_21 = arith.constant 0 : index
    %c0_22 = arith.constant 0 : index
    %36 = vector.load %arg7[%c0_20, %c0_21, %c0_22] : memref<1x1x32xf32, #tpu.memory_space<vmem>>, vector<1x1x32xf32>
    %37 = vector.shape_cast %36 : vector<1x1x32xf32> to vector<1x32xf32>
    %38 = vector.broadcast %37 : vector<1x32xf32> to vector<8x32xf32>
    %39 = arith.addf %35, %38 : vector<8x32xf32>
    %40 = arith.truncf %39 : vector<8x32xf32> to vector<8x32xbf16>
    %c0_23 = arith.constant 0 : index
    %c0_24 = arith.constant 0 : index
    %c0_25 = arith.constant 0 : index
    %41 = vector.load %arg8[%c0_23, %c0_24, %c0_25] : memref<1x32x32xbf16, #tpu.memory_space<vmem>>, vector<1x32x32xbf16>
    %42 = vector.shape_cast %41 : vector<1x32x32xbf16> to vector<32x32xbf16>
    %cst_26 = arith.constant dense<0.000000e+00> : vector<8x32xf32>
    %43 = tpu.matmul %32, %42, %cst_26 {dimension_numbers = #tpu.dot_dimension_numbers<[1], [0], [0], [1], [0, 0, 1, 1], [], []>} : vector<8x32xbf16>, vector<32x32xbf16>, vector<8x32xf32> -> vector<8x32xf32>
    %c0_27 = arith.constant 0 : index
    %c0_28 = arith.constant 0 : index
    %c0_29 = arith.constant 0 : index
    %44 = vector.load %arg9[%c0_27, %c0_28, %c0_29] : memref<1x1x32xf32, #tpu.memory_space<vmem>>, vector<1x1x32xf32>
    %45 = vector.shape_cast %44 : vector<1x1x32xf32> to vector<1x32xf32>
    %46 = vector.broadcast %45 : vector<1x32xf32> to vector<8x32xf32>
    %47 = arith.addf %43, %46 : vector<8x32xf32>
    %48 = arith.truncf %47 : vector<8x32xf32> to vector<8x32xbf16>
    %c0_30 = arith.constant 0 : index
    %c0_31 = arith.constant 0 : index
    %c0_32 = arith.constant 0 : index
    %49 = vector.load %arg10[%c0_30, %c0_31, %c0_32] : memref<1x32x32xbf16, #tpu.memory_space<vmem>>, vector<1x32x32xbf16>
    %50 = vector.shape_cast %49 : vector<1x32x32xbf16> to vector<32x32xbf16>
    %cst_33 = arith.constant dense<0.000000e+00> : vector<8x32xf32>
    %51 = tpu.matmul %32, %50, %cst_33 {dimension_numbers = #tpu.dot_dimension_numbers<[1], [0], [0], [1], [0, 0, 1, 1], [], []>} : vector<8x32xbf16>, vector<32x32xbf16>, vector<8x32xf32> -> vector<8x32xf32>
    %c0_34 = arith.constant 0 : index
    %c0_35 = arith.constant 0 : index
    %c0_36 = arith.constant 0 : index
    %52 = vector.load %arg11[%c0_34, %c0_35, %c0_36] : memref<1x1x32xf32, #tpu.memory_space<vmem>>, vector<1x1x32xf32>
    %53 = vector.shape_cast %52 : vector<1x1x32xf32> to vector<1x32xf32>
    %54 = vector.broadcast %53 : vector<1x32xf32> to vector<8x32xf32>
    %55 = arith.addf %51, %54 : vector<8x32xf32>
    %56 = arith.truncf %55 : vector<8x32xf32> to vector<8x32xbf16>
    %57 = vector.extract_strided_slice %40 {offsets = [0, 0], sizes = [8, 8], strides = [1, 1]} : vector<8x32xbf16> to vector<8x8xbf16>
    %58 = vector.shape_cast %57 : vector<8x8xbf16> to vector<1x8x8xbf16>
    %59 = vector.extract_strided_slice %48 {offsets = [0, 0], sizes = [8, 8], strides = [1, 1]} : vector<8x32xbf16> to vector<8x8xbf16>
    %60 = vector.shape_cast %59 : vector<8x8xbf16> to vector<1x8x8xbf16>
    %61 = vector.extract_strided_slice %56 {offsets = [0, 0], sizes = [8, 8], strides = [1, 1]} : vector<8x32xbf16> to vector<8x8xbf16>
    %62 = vector.shape_cast %61 : vector<8x8xbf16> to vector<1x8x8xbf16>
    "tpu.trace_start"() <{level = 10 : i32, message = "bqd,bkd->bqk"}> : () -> ()
    %cst_37 = arith.constant dense<0.000000e+00> : vector<1x8x8xf32>
    %63 = tpu.matmul %58, %60, %cst_37 {dimension_numbers = #tpu.dot_dimension_numbers<[2], [2], [1], [1], [0, 0, 0, 1, 1, 1], [0], [0]>} : vector<1x8x8xbf16>, vector<1x8x8xbf16>, vector<1x8x8xf32> -> vector<1x8x8xf32>
    %cst_38 = arith.constant -1.000000e+09 : f32
    "tpu.trace_stop"() : () -> ()
    %64 = vector.shape_cast %6 : vector<1x1x8xi1> to vector<1x1x8xi1>
    %65 = vector.broadcast %64 : vector<1x1x8xi1> to vector<1x8x8xi1>
    %66 = vector.broadcast %cst_38 : f32 to vector<1x8x8xf32>
    %67 = arith.select %65, %63, %66 : vector<1x8x8xi1>, vector<1x8x8xf32>
    %cst_39 = arith.constant dense<0xFF800000> : vector<1x8xf32>
    %68 = vector.multi_reduction <maximumf>, %67, %cst_39 [2] : vector<1x8x8xf32> to vector<1x8xf32>
    %69 = vector.shape_cast %68 : vector<1x8xf32> to vector<1x8x1xf32>
    %70 = vector.broadcast %69 : vector<1x8x1xf32> to vector<1x8x8xf32>
    %71 = arith.subf %67, %70 : vector<1x8x8xf32>
    %72 = math.exp %71 : vector<1x8x8xf32>
    %cst_40 = arith.constant dense<0.000000e+00> : vector<1x8xf32>
    %73 = vector.multi_reduction <add>, %72, %cst_40 [2] : vector<1x8x8xf32> to vector<1x8xf32>
    %74 = vector.shape_cast %73 : vector<1x8xf32> to vector<1x8x1xf32>
    %75 = tpu.reciprocal %74 {approx = true} : vector<1x8x1xf32> -> vector<1x8x1xf32>
    %76 = vector.broadcast %75 : vector<1x8x1xf32> to vector<1x8x8xf32>
    %77 = arith.mulf %72, %76 : vector<1x8x8xf32>
    %78 = arith.truncf %77 : vector<1x8x8xf32> to vector<1x8x8xbf16>
    "tpu.trace_start"() <{level = 10 : i32, message = "bqk,bkd->bqd"}> : () -> ()
    %cst_41 = arith.constant dense<0.000000e+00> : vector<1x8x8xf32>
    %79 = tpu.matmul %78, %62, %cst_41 {dimension_numbers = #tpu.dot_dimension_numbers<[2], [1], [1], [2], [0, 0, 0, 1, 1, 2], [0], [0]>} : vector<1x8x8xbf16>, vector<1x8x8xbf16>, vector<1x8x8xf32> -> vector<1x8x8xf32>
    "tpu.trace_stop"() : () -> ()
    %80 = vector.shape_cast %79 : vector<1x8x8xf32> to vector<8x8xf32>
    %81 = arith.truncf %80 : vector<8x8xf32> to vector<8x8xbf16>
    %c0_42 = arith.constant 0 : index
    %c0_43 = arith.constant 0 : index
    %82 = vector.load %arg22[%c0_42, %c0_43] : memref<8x32xbf16, #tpu.memory_space<vmem>>, vector<8x8xbf16>
    tpu.vector_store %arg22[%c0_42, %c0_43], %81 {strides = array<i32>} : memref<8x32xbf16, #tpu.memory_space<vmem>>, vector<8x8xbf16>,
    %83 = vector.extract_strided_slice %40 {offsets = [0, 8], sizes = [8, 8], strides = [1, 1]} : vector<8x32xbf16> to vector<8x8xbf16>
    %84 = vector.shape_cast %83 : vector<8x8xbf16> to vector<1x8x8xbf16>
    %85 = vector.extract_strided_slice %48 {offsets = [0, 8], sizes = [8, 8], strides = [1, 1]} : vector<8x32xbf16> to vector<8x8xbf16>
    %86 = vector.shape_cast %85 : vector<8x8xbf16> to vector<1x8x8xbf16>
    %87 = vector.extract_strided_slice %56 {offsets = [0, 8], sizes = [8, 8], strides = [1, 1]} : vector<8x32xbf16> to vector<8x8xbf16>
    %88 = vector.shape_cast %87 : vector<8x8xbf16> to vector<1x8x8xbf16>
    "tpu.trace_start"() <{level = 10 : i32, message = "bqd,bkd->bqk"}> : () -> ()
    %cst_44 = arith.constant dense<0.000000e+00> : vector<1x8x8xf32>
    %89 = tpu.matmul %84, %86, %cst_44 {dimension_numbers = #tpu.dot_dimension_numbers<[2], [2], [1], [1], [0, 0, 0, 1, 1, 1], [0], [0]>} : vector<1x8x8xbf16>, vector<1x8x8xbf16>, vector<1x8x8xf32> -> vector<1x8x8xf32>
    %cst_45 = arith.constant -1.000000e+09 : f32
    "tpu.trace_stop"() : () -> ()
    %90 = vector.shape_cast %6 : vector<1x1x8xi1> to vector<1x1x8xi1>
    %91 = vector.broadcast %90 : vector<1x1x8xi1> to vector<1x8x8xi1>
    %92 = vector.broadcast %cst_45 : f32 to vector<1x8x8xf32>
    %93 = arith.select %91, %89, %92 : vector<1x8x8xi1>, vector<1x8x8xf32>
    %cst_46 = arith.constant dense<0xFF800000> : vector<1x8xf32>
    %94 = vector.multi_reduction <maximumf>, %93, %cst_46 [2] : vector<1x8x8xf32> to vector<1x8xf32>
    %95 = vector.shape_cast %94 : vector<1x8xf32> to vector<1x8x1xf32>
    %96 = vector.broadcast %95 : vector<1x8x1xf32> to vector<1x8x8xf32>
    %97 = arith.subf %93, %96 : vector<1x8x8xf32>
    %98 = math.exp %97 : vector<1x8x8xf32>
    %cst_47 = arith.constant dense<0.000000e+00> : vector<1x8xf32>
    %99 = vector.multi_reduction <add>, %98, %cst_47 [2] : vector<1x8x8xf32> to vector<1x8xf32>
    %100 = vector.shape_cast %99 : vector<1x8xf32> to vector<1x8x1xf32>
    %101 = tpu.reciprocal %100 {approx = true} : vector<1x8x1xf32> -> vector<1x8x1xf32>
    %102 = vector.broadcast %101 : vector<1x8x1xf32> to vector<1x8x8xf32>
    %103 = arith.mulf %98, %102 : vector<1x8x8xf32>
    %104 = arith.truncf %103 : vector<1x8x8xf32> to vector<1x8x8xbf16>
    "tpu.trace_start"() <{level = 10 : i32, message = "bqk,bkd->bqd"}> : () -> ()
    %cst_48 = arith.constant dense<0.000000e+00> : vector<1x8x8xf32>
    %105 = tpu.matmul %104, %88, %cst_48 {dimension_numbers = #tpu.dot_dimension_numbers<[2], [1], [1], [2], [0, 0, 0, 1, 1, 2], [0], [0]>} : vector<1x8x8xbf16>, vector<1x8x8xbf16>, vector<1x8x8xf32> -> vector<1x8x8xf32>
    "tpu.trace_stop"() : () -> ()
    %106 = vector.shape_cast %105 : vector<1x8x8xf32> to vector<8x8xf32>
    %107 = arith.truncf %106 : vector<8x8xf32> to vector<8x8xbf16>
    %c0_49 = arith.constant 0 : index
    %c8 = arith.constant 8 : index
    %108 = vector.load %arg22[%c0_49, %c8] : memref<8x32xbf16, #tpu.memory_space<vmem>>, vector<8x8xbf16>
    tpu.vector_store %arg22[%c0_49, %c8], %107 {strides = array<i32>} : memref<8x32xbf16, #tpu.memory_space<vmem>>, vector<8x8xbf16>,
    %109 = vector.extract_strided_slice %40 {offsets = [0, 16], sizes = [8, 8], strides = [1, 1]} : vector<8x32xbf16> to vector<8x8xbf16>
    %110 = vector.shape_cast %109 : vector<8x8xbf16> to vector<1x8x8xbf16>
    %111 = vector.extract_strided_slice %48 {offsets = [0, 16], sizes = [8, 8], strides = [1, 1]} : vector<8x32xbf16> to vector<8x8xbf16>
    %112 = vector.shape_cast %111 : vector<8x8xbf16> to vector<1x8x8xbf16>
    %113 = vector.extract_strided_slice %56 {offsets = [0, 16], sizes = [8, 8], strides = [1, 1]} : vector<8x32xbf16> to vector<8x8xbf16>
    %114 = vector.shape_cast %113 : vector<8x8xbf16> to vector<1x8x8xbf16>
    "tpu.trace_start"() <{level = 10 : i32, message = "bqd,bkd->bqk"}> : () -> ()
    %cst_50 = arith.constant dense<0.000000e+00> : vector<1x8x8xf32>
    %115 = tpu.matmul %110, %112, %cst_50 {dimension_numbers = #tpu.dot_dimension_numbers<[2], [2], [1], [1], [0, 0, 0, 1, 1, 1], [0], [0]>} : vector<1x8x8xbf16>, vector<1x8x8xbf16>, vector<1x8x8xf32> -> vector<1x8x8xf32>
    %cst_51 = arith.constant -1.000000e+09 : f32
    "tpu.trace_stop"() : () -> ()
    %116 = vector.shape_cast %6 : vector<1x1x8xi1> to vector<1x1x8xi1>
    %117 = vector.broadcast %116 : vector<1x1x8xi1> to vector<1x8x8xi1>
    %118 = vector.broadcast %cst_51 : f32 to vector<1x8x8xf32>
    %119 = arith.select %117, %115, %118 : vector<1x8x8xi1>, vector<1x8x8xf32>
    %cst_52 = arith.constant dense<0xFF800000> : vector<1x8xf32>
    %120 = vector.multi_reduction <maximumf>, %119, %cst_52 [2] : vector<1x8x8xf32> to vector<1x8xf32>
    %121 = vector.shape_cast %120 : vector<1x8xf32> to vector<1x8x1xf32>
    %122 = vector.broadcast %121 : vector<1x8x1xf32> to vector<1x8x8xf32>
    %123 = arith.subf %119, %122 : vector<1x8x8xf32>
    %124 = math.exp %123 : vector<1x8x8xf32>
    %cst_53 = arith.constant dense<0.000000e+00> : vector<1x8xf32>
    %125 = vector.multi_reduction <add>, %124, %cst_53 [2] : vector<1x8x8xf32> to vector<1x8xf32>
    %126 = vector.shape_cast %125 : vector<1x8xf32> to vector<1x8x1xf32>
    %127 = tpu.reciprocal %126 {approx = true} : vector<1x8x1xf32> -> vector<1x8x1xf32>
    %128 = vector.broadcast %127 : vector<1x8x1xf32> to vector<1x8x8xf32>
    %129 = arith.mulf %124, %128 : vector<1x8x8xf32>
    %130 = arith.truncf %129 : vector<1x8x8xf32> to vector<1x8x8xbf16>
    "tpu.trace_start"() <{level = 10 : i32, message = "bqk,bkd->bqd"}> : () -> ()
    %cst_54 = arith.constant dense<0.000000e+00> : vector<1x8x8xf32>
    %131 = tpu.matmul %130, %114, %cst_54 {dimension_numbers = #tpu.dot_dimension_numbers<[2], [1], [1], [2], [0, 0, 0, 1, 1, 2], [0], [0]>} : vector<1x8x8xbf16>, vector<1x8x8xbf16>, vector<1x8x8xf32> -> vector<1x8x8xf32>
    "tpu.trace_stop"() : () -> ()
    %132 = vector.shape_cast %131 : vector<1x8x8xf32> to vector<8x8xf32>
    %133 = arith.truncf %132 : vector<8x8xf32> to vector<8x8xbf16>
    %c0_55 = arith.constant 0 : index
    %c16 = arith.constant 16 : index
    %134 = vector.load %arg22[%c0_55, %c16] : memref<8x32xbf16, #tpu.memory_space<vmem>>, vector<8x8xbf16>
    tpu.vector_store %arg22[%c0_55, %c16], %133 {strides = array<i32>} : memref<8x32xbf16, #tpu.memory_space<vmem>>, vector<8x8xbf16>,
    %135 = vector.extract_strided_slice %40 {offsets = [0, 24], sizes = [8, 8], strides = [1, 1]} : vector<8x32xbf16> to vector<8x8xbf16>
    %136 = vector.shape_cast %135 : vector<8x8xbf16> to vector<1x8x8xbf16>
    %137 = vector.extract_strided_slice %48 {offsets = [0, 24], sizes = [8, 8], strides = [1, 1]} : vector<8x32xbf16> to vector<8x8xbf16>
    %138 = vector.shape_cast %137 : vector<8x8xbf16> to vector<1x8x8xbf16>
    %139 = vector.extract_strided_slice %56 {offsets = [0, 24], sizes = [8, 8], strides = [1, 1]} : vector<8x32xbf16> to vector<8x8xbf16>
    %140 = vector.shape_cast %139 : vector<8x8xbf16> to vector<1x8x8xbf16>
    "tpu.trace_start"() <{level = 10 : i32, message = "bqd,bkd->bqk"}> : () -> ()
    %cst_56 = arith.constant dense<0.000000e+00> : vector<1x8x8xf32>
    %141 = tpu.matmul %136, %138, %cst_56 {dimension_numbers = #tpu.dot_dimension_numbers<[2], [2], [1], [1], [0, 0, 0, 1, 1, 1], [0], [0]>} : vector<1x8x8xbf16>, vector<1x8x8xbf16>, vector<1x8x8xf32> -> vector<1x8x8xf32>
    %cst_57 = arith.constant -1.000000e+09 : f32
    "tpu.trace_stop"() : () -> ()
    %142 = vector.shape_cast %6 : vector<1x1x8xi1> to vector<1x1x8xi1>
    %143 = vector.broadcast %142 : vector<1x1x8xi1> to vector<1x8x8xi1>
    %144 = vector.broadcast %cst_57 : f32 to vector<1x8x8xf32>
    %145 = arith.select %143, %141, %144 : vector<1x8x8xi1>, vector<1x8x8xf32>
    %cst_58 = arith.constant dense<0xFF800000> : vector<1x8xf32>
    %146 = vector.multi_reduction <maximumf>, %145, %cst_58 [2] : vector<1x8x8xf32> to vector<1x8xf32>
    %147 = vector.shape_cast %146 : vector<1x8xf32> to vector<1x8x1xf32>
    %148 = vector.broadcast %147 : vector<1x8x1xf32> to vector<1x8x8xf32>
    %149 = arith.subf %145, %148 : vector<1x8x8xf32>
    %150 = math.exp %149 : vector<1x8x8xf32>
    %cst_59 = arith.constant dense<0.000000e+00> : vector<1x8xf32>
    %151 = vector.multi_reduction <add>, %150, %cst_59 [2] : vector<1x8x8xf32> to vector<1x8xf32>
    %152 = vector.shape_cast %151 : vector<1x8xf32> to vector<1x8x1xf32>
    %153 = tpu.reciprocal %152 {approx = true} : vector<1x8x1xf32> -> vector<1x8x1xf32>
    %154 = vector.broadcast %153 : vector<1x8x1xf32> to vector<1x8x8xf32>
    %155 = arith.mulf %150, %154 : vector<1x8x8xf32>
    %156 = arith.truncf %155 : vector<1x8x8xf32> to vector<1x8x8xbf16>
    "tpu.trace_start"() <{level = 10 : i32, message = "bqk,bkd->bqd"}> : () -> ()
    %cst_60 = arith.constant dense<0.000000e+00> : vector<1x8x8xf32>
    %157 = tpu.matmul %156, %140, %cst_60 {dimension_numbers = #tpu.dot_dimension_numbers<[2], [1], [1], [2], [0, 0, 0, 1, 1, 2], [0], [0]>} : vector<1x8x8xbf16>, vector<1x8x8xbf16>, vector<1x8x8xf32> -> vector<1x8x8xf32>
    "tpu.trace_stop"() : () -> ()
    %158 = vector.shape_cast %157 : vector<1x8x8xf32> to vector<8x8xf32>
    %159 = arith.truncf %158 : vector<8x8xf32> to vector<8x8xbf16>
    %c0_61 = arith.constant 0 : index
    %c24 = arith.constant 24 : index
    %160 = vector.load %arg22[%c0_61, %c24] : memref<8x32xbf16, #tpu.memory_space<vmem>>, vector<8x8xbf16>
    tpu.vector_store %arg22[%c0_61, %c24], %159 {strides = array<i32>} : memref<8x32xbf16, #tpu.memory_space<vmem>>, vector<8x8xbf16>,
    %c0_62 = arith.constant 0 : index
    %c0_63 = arith.constant 0 : index
    %161 = vector.load %arg22[%c0_62, %c0_63] : memref<8x32xbf16, #tpu.memory_space<vmem>>, vector<8x32xbf16>
    %c0_64 = arith.constant 0 : index
    %c0_65 = arith.constant 0 : index
    %c0_66 = arith.constant 0 : index
    %162 = vector.load %arg12[%c0_64, %c0_65, %c0_66] : memref<1x32x32xbf16, #tpu.memory_space<vmem>>, vector<1x32x32xbf16>
    %163 = vector.shape_cast %162 : vector<1x32x32xbf16> to vector<32x32xbf16>
    %cst_67 = arith.constant dense<0.000000e+00> : vector<8x32xf32>
    %164 = tpu.matmul %161, %163, %cst_67 {dimension_numbers = #tpu.dot_dimension_numbers<[1], [0], [0], [1], [0, 0, 1, 1], [], []>} : vector<8x32xbf16>, vector<32x32xbf16>, vector<8x32xf32> -> vector<8x32xf32>
    %c0_68 = arith.constant 0 : index
    %c0_69 = arith.constant 0 : index
    %c0_70 = arith.constant 0 : index
    %165 = vector.load %arg13[%c0_68, %c0_69, %c0_70] : memref<1x1x32xf32, #tpu.memory_space<vmem>>, vector<1x1x32xf32>
    %166 = vector.shape_cast %165 : vector<1x1x32xf32> to vector<1x32xf32>
    %167 = vector.broadcast %166 : vector<1x32xf32> to vector<8x32xf32>
    %168 = arith.addf %164, %167 : vector<8x32xf32>
    %169 = arith.addf %3, %168 : vector<8x32xf32>
    %c0_71 = arith.constant 0 : index
    %c0_72 = arith.constant 0 : index
    %c0_73 = arith.constant 0 : index
    %170 = vector.load %arg14[%c0_71, %c0_72, %c0_73] : memref<1x1x32xf32, #tpu.memory_space<vmem>>, vector<1x1x32xf32>
    %171 = vector.shape_cast %170 : vector<1x1x32xf32> to vector<1x32xf32>
    %c0_74 = arith.constant 0 : index
    %c0_75 = arith.constant 0 : index
    %c0_76 = arith.constant 0 : index
    %172 = vector.load %arg15[%c0_74, %c0_75, %c0_76] : memref<1x1x32xf32, #tpu.memory_space<vmem>>, vector<1x1x32xf32>
    %173 = vector.shape_cast %172 : vector<1x1x32xf32> to vector<1x32xf32>
    %cst_77 = arith.constant dense<0.000000e+00> : vector<8xf32>
    %174 = vector.multi_reduction <add>, %169, %cst_77 [1] : vector<8x32xf32> to vector<8xf32>
    %175 = vector.shape_cast %174 : vector<8xf32> to vector<8x1xf32>
    %cst_78 = arith.constant 3.200000e+01 : f32
    %176 = vector.broadcast %cst_78 : f32 to vector<8x1xf32>
    %177 = arith.divf %175, %176 : vector<8x1xf32>
    %178 = vector.broadcast %177 : vector<8x1xf32> to vector<8x32xf32>
    %179 = arith.subf %169, %178 : vector<8x32xf32>
    %180 = arith.mulf %179, %179 : vector<8x32xf32>
    %cst_79 = arith.constant dense<0.000000e+00> : vector<8xf32>
    %181 = vector.multi_reduction <add>, %180, %cst_79 [1] : vector<8x32xf32> to vector<8xf32>
    %182 = vector.shape_cast %181 : vector<8xf32> to vector<8x1xf32>
    %cst_80 = arith.constant 0.0322580636 : f32
    %183 = vector.broadcast %cst_80 : f32 to vector<8x1xf32>
    %184 = arith.mulf %182, %183 : vector<8x1xf32>
    %185 = math.sqrt %184 : vector<8x1xf32>
    %cst_81 = arith.constant 9.99999997E-7 : f32
    %186 = vector.broadcast %cst_81 : f32 to vector<8x1xf32>
    %187 = arith.addf %185, %186 : vector<8x1xf32>
    %188 = tpu.reciprocal %187 {approx = true} : vector<8x1xf32> -> vector<8x1xf32>
    %189 = vector.broadcast %171 : vector<1x32xf32> to vector<8x32xf32>
    %190 = arith.mulf %189, %179 : vector<8x32xf32>
    %191 = vector.broadcast %188 : vector<8x1xf32> to vector<8x32xf32>
    %192 = arith.mulf %190, %191 : vector<8x32xf32>
    %193 = vector.broadcast %173 : vector<1x32xf32> to vector<8x32xf32>
    %194 = arith.addf %192, %193 : vector<8x32xf32>
    %195 = arith.truncf %194 : vector<8x32xf32> to vector<8x32xbf16>
    %c0_82 = arith.constant 0 : index
    %c0_83 = arith.constant 0 : index
    %c0_84 = arith.constant 0 : index
    %196 = vector.load %arg16[%c0_82, %c0_83, %c0_84] : memref<1x32x128xbf16, #tpu.memory_space<vmem>>, vector<1x32x128xbf16>
    %197 = vector.shape_cast %196 : vector<1x32x128xbf16> to vector<32x128xbf16>
    %cst_85 = arith.constant dense<0.000000e+00> : vector<8x128xf32>
    %198 = tpu.matmul %195, %197, %cst_85 {dimension_numbers = #tpu.dot_dimension_numbers<[1], [0], [0], [1], [0, 0, 1, 1], [], []>} : vector<8x32xbf16>, vector<32x128xbf16>, vector<8x128xf32> -> vector<8x128xf32>
    %c0_86 = arith.constant 0 : index
    %c0_87 = arith.constant 0 : index
    %c0_88 = arith.constant 0 : index
    %199 = vector.load %arg17[%c0_86, %c0_87, %c0_88] : memref<1x1x128xf32, #tpu.memory_space<vmem>>, vector<1x1x128xf32>
    %200 = vector.shape_cast %199 : vector<1x1x128xf32> to vector<1x128xf32>
    %201 = vector.broadcast %200 : vector<1x128xf32> to vector<8x128xf32>
    %202 = arith.addf %198, %201 : vector<8x128xf32>
    %cst_89 = arith.constant 5.000000e-01 : f32
    %203 = vector.broadcast %cst_89 : f32 to vector<8x128xf32>
    %204 = arith.mulf %203, %202 : vector<8x128xf32>
    %205 = arith.mulf %202, %202 : vector<8x128xf32>
    %206 = arith.mulf %202, %205 : vector<8x128xf32>
    %cst_90 = arith.constant 4.471500e-02 : f32
    %207 = vector.broadcast %cst_90 : f32 to vector<8x128xf32>
    %208 = arith.mulf %207, %206 : vector<8x128xf32>
    %209 = arith.addf %202, %208 : vector<8x128xf32>
    %cst_91 = arith.constant 0.797884583 : f32
    %210 = vector.broadcast %cst_91 : f32 to vector<8x128xf32>
    %211 = arith.mulf %210, %209 : vector<8x128xf32>
    %212 = math.tanh %211 : vector<8x128xf32>
    %cst_92 = arith.constant 1.000000e+00 : f32
    %213 = vector.broadcast %cst_92 : f32 to vector<8x128xf32>
    %214 = arith.addf %213, %212 : vector<8x128xf32>
    %215 = arith.mulf %204, %214 : vector<8x128xf32>
    %216 = arith.truncf %215 : vector<8x128xf32> to vector<8x128xbf16>
    %c0_93 = arith.constant 0 : index
    %c0_94 = arith.constant 0 : index
    %c0_95 = arith.constant 0 : index
    %217 = vector.load %arg18[%c0_93, %c0_94, %c0_95] : memref<1x128x32xbf16, #tpu.memory_space<vmem>>, vector<1x128x32xbf16>
    %218 = vector.shape_cast %217 : vector<1x128x32xbf16> to vector<128x32xbf16>
    %cst_96 = arith.constant dense<0.000000e+00> : vector<8x32xf32>
    %219 = tpu.matmul %216, %218, %cst_96 {dimension_numbers = #tpu.dot_dimension_numbers<[1], [0], [0], [1], [0, 0, 1, 1], [], []>} : vector<8x128xbf16>, vector<128x32xbf16>, vector<8x32xf32> -> vector<8x32xf32>
    %c0_97 = arith.constant 0 : index
    %c0_98 = arith.constant 0 : index
    %c0_99 = arith.constant 0 : index
    %220 = vector.load %arg19[%c0_97, %c0_98, %c0_99] : memref<1x1x32xf32, #tpu.memory_space<vmem>>, vector<1x1x32xf32>
    %221 = vector.shape_cast %220 : vector<1x1x32xf32> to vector<1x32xf32>
    %222 = vector.broadcast %221 : vector<1x32xf32> to vector<8x32xf32>
    %223 = arith.addf %219, %222 : vector<8x32xf32>
    %224 = arith.addf %169, %223 : vector<8x32xf32>
    %c0_100 = arith.constant 0 : index
    %c0_101 = arith.constant 0 : index
    %225 = vector.load %arg21[%c0_100, %c0_101] : memref<8x32xf32, #tpu.memory_space<vmem>>, vector<8x32xf32>
    tpu.vector_store %arg21[%c0_100, %c0_101], %224 {strides = array<i32>} : memref<8x32xf32, #tpu.memory_space<vmem>>, vector<8x32xf32>,
    %c1_i32 = arith.constant 1 : i32
    %226 = arith.cmpi eq, %arg1, %c1_i32 : i32
    %227 = arith.extui %226 : i1 to i32
    %c0_i32_102 = arith.constant 0 : i32
    %228 = arith.cmpi ne, %227, %c0_i32_102 : i32
    scf.if %228 {
      %229 = vector.shape_cast %224 : vector<8x32xf32> to vector<1x8x32xf32>
      %c0_103 = arith.constant 0 : index
      %c0_104 = arith.constant 0 : index
      %c0_105 = arith.constant 0 : index
      %230 = vector.load %arg20[%c0_103, %c0_104, %c0_105] : memref<1x8x32xf32, #tpu.memory_space<vmem>>, vector<1x8x32xf32>
      tpu.vector_store %arg20[%c0_103, %c0_104, %c0_105], %229 {strides = array<i32>} : memref<1x8x32xf32, #tpu.memory_space<vmem>>, vector<1x8x32xf32>,
    } else {
    }
    return
  }
  func.func @transform_0(%arg0: i32, %arg1: i32) -> (i32, i32, i32) {
    %c0_i32 = arith.constant 0 : i32
    %c0_i32_0 = arith.constant 0 : i32
    %c0_i32_1 = arith.constant 0 : i32
    return %arg0, %c0_i32, %c0_i32_0 : i32, i32, i32
  }
  func.func @transform_1(%arg0: i32, %arg1: i32) -> (i32, i32, i32) {
    %c0_i32 = arith.constant 0 : i32
    %c0_i32_0 = arith.constant 0 : i32
    %c0_i32_1 = arith.constant 0 : i32
    return %arg0, %c0_i32, %c0_i32_0 : i32, i32, i32
  }
  func.func @transform_2(%arg0: i32, %arg1: i32) -> (i32, i32, i32) {
    %c0_i32 = arith.constant 0 : i32
    %c0_i32_0 = arith.constant 0 : i32
    %c0_i32_1 = arith.constant 0 : i32
    return %arg1, %c0_i32, %c0_i32_0 : i32, i32, i32
  }
  func.func @transform_3(%arg0: i32, %arg1: i32) -> (i32, i32, i32) {
    %c0_i32 = arith.constant 0 : i32
    %c0_i32_0 = arith.constant 0 : i32
    %c0_i32_1 = arith.constant 0 : i32
    return %arg1, %c0_i32, %c0_i32_0 : i32, i32, i32
  }
  func.func @transform_4(%arg0: i32, %arg1: i32) -> (i32, i32, i32) {
    %c0_i32 = arith.constant 0 : i32
    %c0_i32_0 = arith.constant 0 : i32
    %c0_i32_1 = arith.constant 0 : i32
    return %arg1, %c0_i32, %c0_i32_0 : i32, i32, i32
  }
  func.func @transform_5(%arg0: i32, %arg1: i32) -> (i32, i32, i32) {
    %c0_i32 = arith.constant 0 : i32
    %c0_i32_0 = arith.constant 0 : i32
    %c0_i32_1 = arith.constant 0 : i32
    return %arg1, %c0_i32, %c0_i32_0 : i32, i32, i32
  }
  func.func @transform_6(%arg0: i32, %arg1: i32) -> (i32, i32, i32) {
    %c0_i32 = arith.constant 0 : i32
    %c0_i32_0 = arith.constant 0 : i32
    %c0_i32_1 = arith.constant 0 : i32
    return %arg1, %c0_i32, %c0_i32_0 : i32, i32, i32
  }
  func.func @transform_7(%arg0: i32, %arg1: i32) -> (i32, i32, i32) {
    %c0_i32 = arith.constant 0 : i32
    %c0_i32_0 = arith.constant 0 : i32
    %c0_i32_1 = arith.constant 0 : i32
    return %arg1, %c0_i32, %c0_i32_0 : i32, i32, i32
  }
  func.func @transform_8(%arg0: i32, %arg1: i32) -> (i32, i32, i32) {
    %c0_i32 = arith.constant 0 : i32
    %c0_i32_0 = arith.constant 0 : i32
    %c0_i32_1 = arith.constant 0 : i32
    return %arg1, %c0_i32, %c0_i32_0 : i32, i32, i32
  }
  func.func @transform_9(%arg0: i32, %arg1: i32) -> (i32, i32, i32) {
    %c0_i32 = arith.constant 0 : i32
    %c0_i32_0 = arith.constant 0 : i32
    %c0_i32_1 = arith.constant 0 : i32
    return %arg1, %c0_i32, %c0_i32_0 : i32, i32, i32
  }
  func.func @transform_10(%arg0: i32, %arg1: i32) -> (i32, i32, i32) {
    %c0_i32 = arith.constant 0 : i32
    %c0_i32_0 = arith.constant 0 : i32
    %c0_i32_1 = arith.constant 0 : i32
    return %arg1, %c0_i32, %c0_i32_0 : i32, i32, i32
  }
  func.func @transform_11(%arg0: i32, %arg1: i32) -> (i32, i32, i32) {
    %c0_i32 = arith.constant 0 : i32
    %c0_i32_0 = arith.constant 0 : i32
    %c0_i32_1 = arith.constant 0 : i32
    return %arg1, %c0_i32, %c0_i32_0 : i32, i32, i32
  }
  func.func @transform_12(%arg0: i32, %arg1: i32) -> (i32, i32, i32) {
    %c0_i32 = arith.constant 0 : i32
    %c0_i32_0 = arith.constant 0 : i32
    %c0_i32_1 = arith.constant 0 : i32
    return %arg1, %c0_i32, %c0_i32_0 : i32, i32, i32
  }
  func.func @transform_13(%arg0: i32, %arg1: i32) -> (i32, i32, i32) {
    %c0_i32 = arith.constant 0 : i32
    %c0_i32_0 = arith.constant 0 : i32
    %c0_i32_1 = arith.constant 0 : i32
    return %arg1, %c0_i32, %c0_i32_0 : i32, i32, i32
  }
  func.func @transform_14(%arg0: i32, %arg1: i32) -> (i32, i32, i32) {
    %c0_i32 = arith.constant 0 : i32
    %c0_i32_0 = arith.constant 0 : i32
    %c0_i32_1 = arith.constant 0 : i32
    return %arg1, %c0_i32, %c0_i32_0 : i32, i32, i32
  }
  func.func @transform_15(%arg0: i32, %arg1: i32) -> (i32, i32, i32) {
    %c0_i32 = arith.constant 0 : i32
    %c0_i32_0 = arith.constant 0 : i32
    %c0_i32_1 = arith.constant 0 : i32
    return %arg1, %c0_i32, %c0_i32_0 : i32, i32, i32
  }
  func.func @transform_16(%arg0: i32, %arg1: i32) -> (i32, i32, i32) {
    %c0_i32 = arith.constant 0 : i32
    %c0_i32_0 = arith.constant 0 : i32
    %c0_i32_1 = arith.constant 0 : i32
    return %arg1, %c0_i32, %c0_i32_0 : i32, i32, i32
  }
  func.func @transform_17(%arg0: i32, %arg1: i32) -> (i32, i32, i32) {
    %c0_i32 = arith.constant 0 : i32
    %c0_i32_0 = arith.constant 0 : i32
    %c0_i32_1 = arith.constant 0 : i32
    return %arg1, %c0_i32, %c0_i32_0 : i32, i32, i32
  }
  func.func @transform_18(%arg0: i32, %arg1: i32) -> (i32, i32, i32) {
    %c0_i32 = arith.constant 0 : i32
    %c0_i32_0 = arith.constant 0 : i32
    %c0_i32_1 = arith.constant 0 : i32
    return %arg0, %c0_i32, %c0_i32_0 : i32, i32, i32
  }
}

</mosaic_0001>

<bundles_post_ra>
// kernel: tpu_custom_call.1
= control target key start
LH: loop header
LB: loop body
LE: loop exit
PB: predicated region body
PF: predicated region fallthrough
CT: control target
= control target key end

     0   :  { %s3226_s0 = inlined_call_operand.hbm [shape: f32[2,8,32], index: 0, kind: input, shape index: {}]   ;;  %s3227_s1 = inlined_call_operand.vmem [shape: f32[2,1,8], index: 1, kind: input, shape index: {}]   ;;  %s3228_s2 = inlined_call_operand.vmem [shape: f32[2,1,32], index: 2, kind: input, shape index: {}]   ;;  %s3229_s3 = inlined_call_operand.vmem [shape: f32[2,1,32], index: 3, kind: input, shape index: {}]   ;;  %s3230_s4 = inlined_call_operand.vmem [shape: bf16[2,32,32], index: 4, kind: input, shape index: {}]   ;;  %s3231_s5 = inlined_call_operand.vmem [shape: f32[2,1,32], index: 5, kind: input, shape index: {}]   ;;  %s3232_s6 = inlined_call_operand.vmem [shape: bf16[2,32,32], index: 6, kind: input, shape index: {}]   ;;  %s3233_s7 = inlined_call_operand.vmem [shape: f32[2,1,32], index: 7, kind: input, shape index: {}]   ;;  %s3234_s8 = inlined_call_operand.vmem [shape: bf16[2,32,32], index: 8, kind: input, shape index: {}]   ;;  %s3235_s9 = inlined_call_operand.vmem [shape: f32[2,1,32], index: 9, kind: input, shape index: {}]   ;;  %s3236_s10 = inlined_call_operand.vmem [shape: bf16[2,32,32], index: 10, kind: input, shape index: {}]   ;;  %s3237_s11 = inlined_call_operand.vmem [shape: f32[2,1,32], index: 11, kind: input, shape index: {}]   ;;  %s3238_s12 = inlined_call_operand.vmem [shape: f32[2,1,32], index: 12, kind: input, shape index: {}]   ;;  %s3239_s13 = inlined_call_operand.vmem [shape: f32[2,1,32], index: 13, kind: input, shape index: {}]   ;;  %s3240_s14 = inlined_call_operand.vmem [shape: bf16[2,32,128], index: 14, kind: input, shape index: {}]   ;;  %s3241_s15 = inlined_call_operand.vmem [shape: f32[2,1,128], index: 15, kind: input, shape index: {}]   ;;  %s3242_s16 = inlined_call_operand.vmem [shape: bf16[2,128,32], index: 16, kind: input, shape index: {}]   ;;  %s3243_s17 = inlined_call_operand.vmem [shape: f32[2,1,32], index: 17, kind: input, shape index: {}]   ;;  %s3244_s18 = inlined_call_operand.hbm [shape: f32[2,8,32], index: 18, kind: output, shape index: {}]  }
   0x1   :  { %3264 = sst [smem:[#allocation25_spill]] %s3226_s0 }
   0x2   :  { %3265 = sst [smem:[#allocation26_spill]] %s3227_s1 }
   0x3   :  { %3266 = sst [smem:[#allocation27_spill]] %s3228_s2 }
   0x4   :  { %3267 = sst [smem:[#allocation28_spill]] %s3230_s4 }
   0x5   :  { %3268 = sst [smem:[#allocation29_spill]] %s3231_s5 }
   0x6   :  { %3269 = sst [smem:[#allocation30_spill]] %s3232_s6 }
   0x7   :  { %3270 = sst [smem:[#allocation31_spill]] %s3234_s8 }
   0x8   :  { %3271 = sst [smem:[#allocation32_spill]] %s3235_s9 }
   0x9   :  { %3272 = sst [smem:[#allocation33_spill]] %s3236_s10 }
   0xa   :  { %3273 = sst [smem:[#allocation34_spill]] %s3237_s11 }
   0xb   :  { %3274 = sst [smem:[#allocation35_spill]] %s3239_s13 }
   0xc   :  { %3275 = sst [smem:[#allocation36_spill]] %s3240_s14 }
   0xd   :  { %3276 = sst [smem:[#allocation37_spill]] %s3241_s15 }
   0xe   :  { %3277 = sst [smem:[#allocation38_spill]] %s3242_s16 }
   0xf   :  { %3278 = sst [smem:[#allocation39_spill]] %s3243_s17 }
  0x10   :  { %3279 = sst [smem:[#allocation40_spill]] %s3244_s18 }
  0x11   :  { %23 = vsyncpa [#allocation5], 0 }
  0x12   :  { %25 = vsyncpa [#allocation5 + $0x1], 0 }
  0x13   :  { %26 = vsyncpa [#allocation6], 0 }
  0x14   :  { %28 = vsyncpa [#allocation6 + $0x1], 0  ;;  %s2761_s27 = smov 0   ;;  %s2763_s28 = smov 0  }
  0x15   :  { %s2765_s29 = smov 0   ;;  %s2767_s30 = smov 0  }
  0x16   :  { %s2769_s0 = smov 0   ;;  %s2771_s19 = smov 0  }
  0x17   :  { %s2773_s1 = smov 0   ;;  %s2775_s20 = smov 0  }
  0x18 LB: > { %3280 = sst [smem:[#allocation10_spill]] %s2625_s27  ;;  %s2166_s21 = sadd.s32 4294967295, %s2653_s20   ;;  %s2653_s20 = sphi %s2775_s20, %s34_s20   ;;  %s2649_s1 = sphi %s2773_s1, %s3350_s1   ;;  %s2645_s19 = sphi %s2771_s19, %s3349_s19   ;;  %s2641_s0 = sphi %s2769_s0, %s3348_s0   ;;  %s2637_s30 = sphi %s2767_s30, %s3347_s30   ;;  %s2633_s29 = sphi %s2765_s29, %s3346_s29   ;;  %s2629_s28 = sphi %s2763_s28, %s3345_s28   ;;  %s2625_s27 = sphi %s2761_s27, %s3344_s27  }
  0x19   : > { %3281 = sst [smem:[#allocation11_spill]] %s2629_s28  ;;  %s2167_s22 = sadd.s32 4294967294, %s2653_s20  }
  0x1a   : > { %3282 = sst [smem:[#allocation12_spill]] %s2633_s29  ;;  %s43_s2 = sadd.s32 1, %s2645_s19 }
  0x1b   : > { %3283 = sst [smem:[#allocation13_spill]] %s2641_s0  ;;  %s46_s23 = sadd.s32 1, %s2649_s1 }
  0x1c   : > { %3284 = sst [smem:[#allocation14_spill]] %s2645_s19  ;;  %p44_p0 = scmp.ge.s32.totalorder %s43_s2, 2 }
  0x1d   : > { %3285 = sst [smem:[#allocation15_spill]] %s2649_s1  ;;  %s53_s24 = sadd.s32 1, %s2633_s29 }
  0x1e   : > { %3286 = sst [smem:[#allocation16_spill]] %s2653_s20  ;;  %p60_p1 = scmp.ne.s32.totalorder %s2633_s29, %s2629_s28 }
  0x1f   : > { %p61_p2 = scmp.eq.s32.totalorder %s2653_s20, 0  ;;  %s3352_s2 = smov (%p44_p0, %s43_s2), 0 }
  0x20   : > { %3287 = sst [smem:[#allocation17_spill]] %s3352_s2  ;;  %s3354_s23 = smov (!%p44_p0, %s46_s23), %s2649_s1 }
  0x21   : > { %p2812_p3 = por %p61_p2, %p60_p1  ;;  %p66_p4 = scmp.ne.s32.totalorder %s2629_s28, %s2625_s27 }
  0x22   : > { %p48_p5 = scmp.ge.s32.totalorder %s3354_s23, 2  ;;  %p67_p6 = scmp.eq.s32.totalorder %s2166_s21, 0 }
  0x23   : > { %p532_p7 = scmp.eq.s32.totalorder %s2166_s21, 3  ;;  %p538_p8 = scmp.eq.s32.totalorder %s2167_s22, 3 }
  0x24   : > { %s3356_s23 = smov (%p48_p5, %s3354_s23), 0  ;;  %p2820_p9 = por %p67_p6, %p66_p4 }
  0x25   : > { %3289 = sst [smem:[#allocation18_spill]] %s3356_s23  ;;  %p2824_p10 = por %p532_p7, %p60_p1 }
  0x26   : > { %s50_s19 = ssub.s32 %s2649_s1, %s3356_s23  ;;  %p2830_p11 = por %p538_p8, %p66_p4 }
  0x27   : > { %s3291_s2 = scalar_select %p2824_p10, 1, 0 }
  0x28   : > { %s3293_s27 = scalar_select %p2830_p11, 1, 0 }
  0x29   : > { %3292 = sst [smem:[#allocation19_spill]] %s3291_s2  ;;  %p51_p12 = scmp.eq.s32.totalorder %s50_s19, 0 }
  0x2a   : > { %3294 = sst [smem:[#allocation20_spill]] %s3293_s27  ;;  %p2406_p13 = scmp.lt.s32.totalorder %s2653_s20, 4 }
  0x2b   : > { %s558_s21 = sand.u32 1, %s2633_s29   ;;  %s2171_s17 = sshll.u32 %s2649_s1, 7 }
  0x2c   : > { %s2837_s22 = scalar_select %p51_p12, %s2633_s29, %s53_s24  }
  0x2d   : > { %s2170_s18 = sshll.u32 %s558_s21, 3  ;;  %s3296_s14 = sld [smem:[#allocation25_spill]] }
  0x2e   : > { %3295 = sst [smem:[#allocation21_spill]] %s2837_s22  ;;  %s562_s23 = scalar_lea.vmem [#allocation4], %s2170_s18 }
  0x2f   : > { %s569_s2 = sshll.u32 %s562_s23, 4  ;;  %p2849_p0 = pnand %p2406_p13, %p2812_p3  ;;  %s2845_s2 = int_to_ptr.vmem [resolvable:$true] %s569_s2 }
  0x30   : > { %s559_s15 = scalar_lea.sflag [#allocation5], %s558_s21 }
  0x31   : > { %p2527_p5 = pneg %p2849_p0 }
  0x33   : > { %s2843_s13 = scalar_lea.hbm %s3296_s14, %s2171_s17  ;;  %s2530_s23 = scalar_lea.hbm %s3296_s14, 256 }
  0x34   : > { %s2525_s16 = scalar_lea.hbm %s2843_s13, 128  ;;  %p2531_p3 = scmp.lt.u32.totalorder %s2843_s13, %s3296_s14 }
  0x35   : > { %p2526_p4 = scmp.ne.s32.totalorder %s2843_s13, %s2525_s16  ;;  %p2532_p8 = scmp.lt.u32.totalorder %s2530_s23, %s2525_s16 }
  0x36   : > { %p2534_p13 = scmp.lt.u32.totalorder %s2525_s16, %s2843_s13 }
  0x37   : > { %p2528_p6 = pnand %p2527_p5, %p2526_p4  ;;  %p2533_p12 = por %p2532_p8, %p2531_p3 }
  0x39   : > { %p2529_p7 = pneg %p2528_p6  ;;  %p2535_p1 = por %p2534_p13, %p2533_p12 }
  0x3b   : > { %p2536_p2 = pnand %p2535_p1, %p2529_p7 }
  0x3d   : > { %2539 = shalt.err (!%p2536_p2)
}
  0x3e   : > { %s2540_s21 = scalar_lea.vmem %s2845_s2, 128  ;;  %s2655_s17 = smov [#allocation4]  }
  0x3f   : > { %p2541_p4 = scmp.ne.s32.totalorder %s2845_s2, %s2540_s21  ;;  %s2545_s18 = sshll.u32 %s2655_s17, 4  ;;  %s2546_s18 = int_to_ptr.vmem [resolvable:$false] %s2545_s18 }
  0x40   : > { %s2547_s24 = scalar_lea.vmem %s2546_s18, 256  ;;  %p2548_p10 = scmp.lt.s32.totalorder %s2845_s2, %s2546_s18 }
  0x41   : > { %p2543_p6 = pnand %p2541_p4, %p2527_p5  ;;  %p2549_p3 = scmp.lt.s32.totalorder %s2547_s24, %s2540_s21 }
  0x43   : > { %p2544_p11 = pneg %p2543_p6  ;;  %p2550_p8 = por %p2549_p3, %p2548_p10 }
  0x45   : > { %p2551_p12 = pnand %p2550_p8, %p2544_p11 }
  0x47   : > { %2554 = shalt.err (!%p2551_p12)
}
  0x48   : > { %2401 = dma.hbm_to_vmem [thread:$0]  (!%p2849_p0), %s2843_s13, 128, %s2845_s2, %s559_s15  }
  0x49   : > { %p3298_p1 = scmp.lt.s32.totalorder %s2653_s20, 5  ;;  %p3299_p2 = scmp.ge.s32.totalorder %s2653_s20, 1 }
  0x4b   : > { %p689_p5 = pnand %p3299_p2, %p3298_p1 }
  0x4d   : > { %692 = sbr.rel (%p689_p5) target bundleno = 2733 (0xaad), region = 92 }
  0x54   : > { %s2885_s16 = sand.u32 1, %s2629_s28  }
  0x55   : > { %3300 = sst [smem:[#allocation22_spill]] %s2885_s16  ;;  %s2173_s23 = sshll.u32 %s2885_s16, 3 }
  0x56   : > { %s695_s25 = scalar_lea.sflag [#allocation5], %s2885_s16  ;;  %s698_s21 = scalar_lea.vmem [#allocation4], %s2173_s23 }
  0x57   : > { %2616 = dma.done.wait (%p2820_p9), %s695_s25, 128  }
  0x58   : > { %2618 = vsyncadd (%p2820_p9), %s695_s25, 4294967168  ;;  %p814_p10 = scmp.lt.s32.totalorder %s2641_s0, 1  ;;  %p817_p11 = scmp.lt.s32.totalorder %s2637_s30, 1 }
  0x59   : > { %s3305_s4 = sld [smem:[#allocation28_spill]]  ;;  %s3306_s6 = sld [smem:[#allocation30_spill]] }
  0x5a   : > { %s2896_s13 = scalar_select %p814_p10, %s2641_s0, 1 }
  0x5b   : > { %s2899_s2 = scalar_select %p817_p11, %s2637_s30, 1 }
  0x5c   : > { %3301 = sst [smem:[#allocation23_spill]] %s2896_s13  ;;  %s3307_s8 = sld [smem:[#allocation31_spill]] }
  0x5d   : > { %s2237_s15 = sshll.u32 %s2899_s2, 4  ;;  %s3309_s10 = sld [smem:[#allocation33_spill]] }
  0x5e   : > { %s3313_s29 = sld [smem:[#allocation36_spill]]  ;;  %s2242_s9 = sshll.u32 %s2899_s2, 6 }
  0x5f   : > { %s2921_s0 = scalar_lea.vmem %s3305_s4, %s2237_s15  ;;  %s2926_s18 = scalar_lea.vmem %s3306_s6, %s2237_s15 }
  0x60   : > { %s3315_s6 = sld [smem:[#allocation38_spill]]  ;;  %s3316_s1 = sld [smem:[#allocation39_spill]] }
  0x61   : > { %p2187_p9 = scmp.ne.s32.totalorder %s2637_s30, 0 }
  0x62   : > { %s2935_s14 = scalar_lea.vmem %s3307_s8, %s2237_s15  ;;  %s3312_s8 = sld [smem:[#allocation35_spill]]  ;;  %v882_v0 = vld [vmem:[%s698_s21] sm:$0xff] (!%p2187_p9)  ;;  %vm883_vm0 = vcmask (!%p2187_p9), 261120  }
  0x63   : > { %s2944_s4 = scalar_lea.vmem %s3309_s10, %s2237_s15  ;;  %s3314_s10 = sld [smem:[#allocation37_spill]]  ;;  %884 = vst.msk [vmem:[#allocation2] sm:$0xff] (!%p2187_p9), %vm883_vm0, %v882_v0 }
  0x64   : > { %3310 = sst [smem:[#allocation24_spill]] %s2944_s4  ;;  %s2961_s20 = scalar_lea.vmem %s3313_s29, %s2237_s15 }
  0x65   : > { %881 = sbr.rel (%p2187_p9) target bundleno = 108 (0x6c), region = 100 }
  0x66   : > { %s2971_s11 = scalar_lea.vmem %s3315_s6, %s2242_s9  ;;  %s876_s19 = scalar_lea.vmem %s3316_s1, %s2899_s2 }
  0x68   : > { %s860_s13 = scalar_lea.vmem %s3312_s8, %s2899_s2  ;;  %s2977_s8 = scalar_lea.vmem [#allocation7], %s2173_s23 }
  0x69   : > { %s868_s4 = scalar_lea.vmem %s3314_s10, %s2899_s2 }
  0x6c PF: > { %v2980_v1 = vld [vmem:[#allocation2] sm:$0xff]  ;;  %vm890_vm1 = vcmask 261120   ;;  %v2656_v9 = vmov 0.0   ;;  %vm2657_vm2 = vmmov 0   ;;  %v2482_v10 = vld [vmem:[%s2921_s0 + $0x8] sm:$0xff]   ;;  %s3317_s9 = sld [smem:[#allocation27_spill]]  ;;  %s3319_s21 = scalar_lea.vmem %s3229_s3, %s2899_s2  ;;  %v1170_v62 = vlaneseq }
  0x6d   : > { %v891_v2 = vsel %vm890_vm1, %v2980_v1, 0.0  ;;  %v2481_v8 = vld [vmem:[%s2921_s0] sm:$0xff]   ;;  %2286 = vmatprep.subr.bf16.mxu0 %v2656_v9  ;;  %2290 = vmatprep.mubr.msk.bf16.mxu0 %vm2657_vm2, %v2656_v9  ;;  %v2484_v27 = vld [vmem:[%s2926_s18 + $0x8] sm:$0xff]   ;;  %s3321_s28 = sld [smem:[#allocation29_spill]]  ;;  %vm1122_vm5 = vcmask 64512   ;;  %s2658_s27 = smov 112  }
  0x6e   : > { %892 = vadd.xlane.f32.xlu0 %v891_v2  ;;  %2287 = vmatpush3.bf16.msra.mxu0 %v2481_v8  ;;  %v2189_v22 = vld [vmem:[%s3319_s21] ss:$0 sm:$0xff]  ;;  %v2486_v29 = vld [vmem:[%s2935_s14 + $0x8] sm:$0xff]   ;;  %s2659_s16 = smov 120   ;;  %s3323_s24 = sld [smem:[#allocation32_spill]]  ;;  %vm1191_vm6 = vcmask 1043456  }
  0x6f   : > { %2310 = vmatprep.subr.bf16.mxu1 %v2656_v9  ;;  %2288 = vmatprep.subr.bf16.mxu0 %v2656_v9  ;;  %v2483_v25 = vld [vmem:[%s2926_s18] sm:$0xff]   ;;  %s2660_s5 = smov 104   ;;  %s3325_s6 = sld [smem:[#allocation23_spill]]  ;;  %v1171_v0 = vshrl.u32 %v1170_v62, 7  ;;  %vm1236_vm9 = vcmask 60416   ;;  %vm1359_vm10 = vcmask 126016  }
  0x70   : > { %2312 = vmatprep.mubr.msk.bf16.mxu1 %vm2657_vm2, %v2656_v9  ;;  %v2485_v28 = vld [vmem:[%s2935_s14] sm:$0xff]   ;;  %s3320_s14 = scalar_lea.vmem %s3233_s7, %s2899_s2  ;;  %s3326_s0 = sld [smem:[#allocation26_spill]]  ;;  %vm1479_vm11 = vcmask 191616   ;;  %vm1599_vm12 = vcmask 257216  }
  0x71   : > { %v2194_v34 = vld [vmem:[%s3320_s14] ss:$0 sm:$0xff]  ;;  %v1172_v2 = vsub.s32 0, %v1171_v0  ;;  %s3328_s21 = sld [smem:[#allocation24_spill]]  ;;  %s2662_s15 = smov 8  }
  0x72   : > { %2289 = vmatpush3.bf16.msra.mxu0 %v2482_v10  ;;  %s3318_s10 = scalar_lea.vmem %s3317_s9, %s2899_s2  ;;  %s2663_s18 = smov 16  }
  0x73   : > { %2294 = vmatprep.subr.bf16.mxu0 %v2656_v9  ;;  %v2188_v19 = vld [vmem:[%s3318_s10] ss:$0 sm:$0xff]  ;;  %s3322_s29 = scalar_lea.vmem %s3321_s28, %s2899_s2  ;;  %s2664_s14 = smov 24  }
  0x74   : > { %v2190_v35 = vld [vmem:[%s3322_s29] ss:$0 sm:$0xff]  ;;  %s3324_s25 = scalar_lea.vmem %s3323_s24, %s2899_s2  ;;  %s3329_s28 = sld [smem:[#allocation34_spill]] }
  0x75   : > { %v2198_v44 = vld [vmem:[%s3324_s25] ss:$0 sm:$0xff]  ;;  %p2232_p0 = scmp.ne.s32.totalorder %s2637_s30, 1 }
  0x76   : > { %s3327_s23 = scalar_lea.vmem %s3326_s0, %s3325_s6 }
  0x77   : > { %v886_v63 = vld [vmem:[%s3327_s23] sm:$0x1] }
  0x78   : > { %vm887_vm7 = vcmp.gt.f32.partialorder %v886_v63, 0.0 }
  0x7a   : > { %s3330_s29 = scalar_lea.vmem %s3329_s28, %s2899_s2 }
  0xfb   : > { %v893_v3 = vpop.xlane.xlu0 %892 }
  0xfc   : > { %v895_v4 = vmul.f32 0.03125, %v893_v3  ;;  %v2661_v3 = vmov 0  }
  0xfe   : > { %v896_v5 = vsub.f32 %v2980_v1, %v895_v4  ;;  %v1169_v4 = vsel %vm887_vm7, 1, %v2661_v3 }
 0x100   : > { %v897_v6 = vmul.f32 %v896_v5, %v896_v5  ;;  %v917_v20 = vmul.f32 %v2188_v19, %v896_v5  ;;  %v1173_v5 = vrot.slane %v1169_v4, %v1172_v2 }
 0x102   : > { %v898_v7 = vsel %vm890_vm1, %v897_v6, 0.0  ;;  %vm1174_vm8 = vcmp.eq.s32.totalorder %v1173_v5, 1 }
 0x103   : > { %899 = vadd.xlane.f32.xlu0 %v898_v7 }
 0x190   : > { %v900_v11 = vpop.xlane.xlu0 %899 }
 0x191   : > { %v901_v12 = vmul.f32 0.032258064, %v900_v11 }
 0x193   : > { %2499 = vrsqrt.f32 %v901_v12  ;;  %vm904_vm3 = vcmp.eq.f32.partialorder %v901_v12, inf  ;;  %v907_v15 = vand.u32 2147483648, %v901_v12  ;;  %vm906_vm4 = vcmp.eq.f32.partialorder %v901_v12, 0.0 }
 0x19d   : > { %v2500_v13 = vpop.eup %2499 }
 0x19e   : > { %v903_v14 = vmul.f32 %v2500_v13, %v901_v12 }
 0x1a0   : > { %v905_v16 = vsel %vm904_vm3, %v901_v12, %v903_v14 }
 0x1a1   : > { %v908_v17 = vsel %vm906_vm4, %v907_v15, %v905_v16 }
 0x1a2   : > { %v909_v18 = vadd.f32 1e-06, %v908_v17 }
 0x1a4   : > { %2501 = vrcp.f32 %v909_v18 }
 0x1ae   : > { %v2502_v21 = vpop.eup %2501 }
 0x1af   : > { %v918_v23 = vmul.f32 %v2502_v21, %v917_v20 }
 0x1b1   : > { %v925_v24 = vadd.f32 %v2189_v22, %v918_v23 }
 0x1b3   : > { %v926_v26 = vpack.c.bf16 %v925_v24, %v925_v24 }
 0x1b5   : > { %2291 = vmatmul.mubr.msk.bf16.vlgmr.msra.gmra.mrb[0].mxu0 %vm890_vm1, %v926_v26 }
 0x1b6   : > { %2295 = vmatpush3.bf16.msra.mxu0 %v2483_v25  ;;  %2298 = vmatprep.mubr.msk.bf16.mxu0 %vm2657_vm2, %v2656_v9 }
 0x1b7   : > { %2296 = vmatprep.subr.bf16.mxu0 %v2656_v9 }
 0x1ba   : > { %2297 = vmatpush3.bf16.msra.mxu0 %v2484_v27 }
 0x1bb   : > { %2302 = vmatprep.subr.bf16.mxu0 %v2656_v9 }
 0x1bd   : > { %2299 = vmatmul.mubr.msk.bf16.vlgmr.msra.gmra.mrb[4].mxu0 %vm890_vm1, %v926_v26 }
 0x1be   : > { %2303 = vmatpush3.bf16.msra.mxu0 %v2485_v28  ;;  %2306 = vmatprep.mubr.msk.bf16.mxu0 %vm2657_vm2, %v2656_v9 }
 0x1bf   : > { %2304 = vmatprep.subr.bf16.mxu0 %v2656_v9 }
 0x1c2   : > { %2305 = vmatpush3.bf16.msra.mxu0 %v2486_v29 }
 0x1c3   : > { %2316 = vmatprep.subr.bf16.mxu0 %v2656_v9 }
 0x1c5   : > { %2307 = vmatmul.mubr.msk.bf16.vlgmr.msra.gmra.mrb[8].mxu0 %vm890_vm1, %v926_v26 }
 0x1c6   : > { %2318 = vmatprep.mubr.msk.bf16.mxu0 %vm2657_vm2, %v2656_v9 }
 0x288   : > { %v987_v30 = vpop.f32.mrb[0].mxu0 }
 0x289   : > { %v2292_v31 = vpop.f32.mrb[1].mxu0  ;;  %v988_v40 = vadd.f32 %v2190_v35, %v987_v30 }
 0x28a   : > { %v990_v32 = vpop.f32.mrb[2].mxu0 }
 0x28b   : > { %v2293_v33 = vpop.f32.mrb[3].mxu0  ;;  %v993_v45 = vpack.c.bf16 %v988_v40, %v988_v40 }
 0x290   : > { %v1051_v36 = vpop.f32.mrb[4].mxu0 }
 0x291   : > { %v1052_v37 = vadd.f32 %v2194_v34, %v1051_v36  ;;  %v2300_v38 = vpop.f32.mrb[5].mxu0 }
 0x292   : > { %v1054_v39 = vpop.f32.mrb[6].mxu0 }
 0x293   : > { %v1057_v41 = vpack.c.bf16 %v1052_v37, %v1052_v37  ;;  %v2301_v42 = vpop.f32.mrb[7].mxu0 }
 0x295   : > { %1363 = vrot.lane.b32.xlu0 %v1057_v41, %s2658_s27  ;;  %1242 = vrot.lane.b32.xlu1 %v1057_v41, %s2659_s16  ;;  %v1127_v43 = vsel %vm1122_vm5, %v1057_v41, 0 }
 0x296   : > { %2311 = vmatpush3.bf16.xpose.msra.mxu1 %v1127_v43 }
 0x297   : > { %2322 = vmatprep.subr.bf16.mxu1 %v2656_v9 }
 0x298   : > { %v1115_v46 = vpop.f32.mrb[8].mxu0 }
 0x299   : > { %v1116_v47 = vadd.f32 %v2198_v44, %v1115_v46  ;;  %1239 = vrot.lane.b32.xlu1 %v993_v45, %s2659_s16  ;;  %v2308_v48 = vpop.f32.mrb[9].mxu0 }
 0x29a   : > { %v1118_v49 = vpop.f32.mrb[10].mxu0 }
 0x29b   : > { %v3043_v50 = vpack.c.bf16 %v1116_v47, %v1116_v47  ;;  %v2309_v51 = vpop.f32.mrb[11].mxu0 }
 0x29d   : > { %1361 = vrot.lane.b32.xlu1 %v993_v45, %s2658_s27  ;;  %2313 = vmatmul.mubr.msk.bf16.vlgmr.msra.gmra.mrb[0].mxu1 %vm1122_vm5, %v993_v45  ;;  %v1193_v52 = vsel %vm1191_vm6, %v3043_v50, 0 }
 0x29e   : > { %2317 = vmatpush3.bf16.msra.mxu0 %v1193_v52  ;;  %2324 = vmatprep.mubr.msk.bf16.mxu1 %vm2657_vm2, %v2656_v9 }
 0x29f   : > { %2328 = vmatprep.subr.bf16.mxu0 %v2656_v9 }
 0x2a1   : > { %1483 = vrot.lane.b32.xlu1 %v1057_v41, %s2660_s5 }
 0x2a5   : > { %1481 = vrot.lane.b32.xlu1 %v993_v45, %s2660_s5 }
 0x307   : > { %v1243_v53 = vpop.permute.xlu1 %1242  ;;  %v1364_v56 = vpop.permute.xlu0 %1363 }
 0x308   : > { %v1248_v54 = vsel %vm1122_vm5, %v1243_v53, 0  ;;  %v1369_v58 = vsel %vm1122_vm5, %v1364_v56, 0 }
 0x309   : > { %2323 = vmatpush3.bf16.xpose.msra.mxu1 %v1248_v54 }
 0x30a   : > { %2334 = vmatprep.subr.bf16.mxu1 %v2656_v9 }
 0x30b   : > { %v1240_v55 = vpop.permute.xlu1 %1239 }
 0x30f   : > { %v1362_v57 = vpop.permute.xlu1 %1361 }
 0x310   : > { %2325 = vmatmul.mubr.msk.bf16.vlgmr.msra.gmra.mrb[4].mxu1 %vm1122_vm5, %v1240_v55 }
 0x311   : > { %2335 = vmatpush3.bf16.xpose.msra.mxu1 %v1369_v58  ;;  %2336 = vmatprep.mubr.msk.bf16.mxu1 %vm2657_vm2, %v2656_v9 }
 0x312   : > { %2346 = vmatprep.subr.bf16.mxu1 %v2656_v9 }
 0x313   : > { %v1484_v59 = vpop.permute.xlu1 %1483 }
 0x314   : > { %v1489_v60 = vsel %vm1122_vm5, %v1484_v59, 0 }
 0x317   : > { %v1482_v61 = vpop.permute.xlu1 %1481 }
 0x318   : > { %2337 = vmatmul.mubr.msk.bf16.vlgmr.msra.gmra.mrb[8].mxu1 %vm1122_vm5, %v1362_v57 }
 0x319   : > { %2347 = vmatpush3.bf16.xpose.msra.mxu1 %v1489_v60  ;;  %2348 = vmatprep.mubr.msk.bf16.mxu1 %vm2657_vm2, %v2656_v9 }
 0x31a   : > { %2358 = vmatprep.subr.bf16.mxu1 %v2656_v9 }
 0x320   : > { %2349 = vmatmul.mubr.msk.bf16.vlgmr.msra.gmra.mrb[12].mxu1 %vm1122_vm5, %v1482_v61 }
 0x321   : > { %2362 = vmatprep.mubr.msk.bf16.mxu1 %vm2657_vm2, %v2656_v9 }
 0x370   : > { %v1163_v6 = vpop.f32.mrb[0].mxu1 }
 0x371   : > { %v1175_v7 = vsel %vm1174_vm8, %v1163_v6, -1e+09  ;;  %v2314_v8 = vpop.f32.mrb[1].mxu1 }
 0x372   : > { %v1166_v10 = vpop.f32.mrb[2].mxu1  ;;  %v1176_v11 = vsel %vm1122_vm5, %v1175_v7, -inf }
 0x373   : > { %1177 = vmax.xlane.f32.xlu1 %v1176_v11  ;;  %v2315_v12 = vpop.f32.mrb[3].mxu1 }
 0x3e3   : > { %v1284_v13 = vpop.f32.mrb[4].mxu1 }
 0x3e4   : > { %v1290_v14 = vsel %vm1174_vm8, %v1284_v13, -1e+09  ;;  %v2326_v15 = vpop.f32.mrb[5].mxu1 }
 0x3e5   : > { %v1287_v16 = vpop.f32.mrb[6].mxu1  ;;  %v1291_v17 = vsel %vm1122_vm5, %v1290_v14, -inf }
 0x3e6   : > { %1292 = vmax.xlane.f32.xlu0 %v1291_v17  ;;  %v2327_v18 = vpop.f32.mrb[7].mxu1 }
 0x3eb   : > { %v1405_v19 = vpop.f32.mrb[8].mxu1 }
 0x3ec   : > { %v1411_v20 = vsel %vm1174_vm8, %v1405_v19, -1e+09  ;;  %v2338_v21 = vpop.f32.mrb[9].mxu1 }
 0x3ed   : > { %v1408_v22 = vpop.f32.mrb[10].mxu1  ;;  %v1412_v23 = vsel %vm1122_vm5, %v1411_v20, -inf }
 0x3ee   : > { %1413 = vmax.xlane.f32.xlu1 %v1412_v23  ;;  %v2339_v24 = vpop.f32.mrb[11].mxu1 }
 0x3f3   : > { %v1525_v25 = vpop.f32.mrb[12].mxu1 }
 0x3f4   : > { %v1531_v26 = vsel %vm1174_vm8, %v1525_v25, -1e+09  ;;  %v2350_v27 = vpop.f32.mrb[13].mxu1 }
 0x3f5   : > { %v1528_v28 = vpop.f32.mrb[14].mxu1  ;;  %v1532_v29 = vsel %vm1122_vm5, %v1531_v26, -inf  ;;  %v2488_v27 = vld [vmem:[%s3328_s21 + $0x8] sm:$0xff]  }
 0x3f6   : > { %1533 = vmax.xlane.f32.xlu1 %v1532_v29  ;;  %v2351_v30 = vpop.f32.mrb[15].mxu1 }
 0x400   : > { %v1178_v31 = vpop.xlane.xlu1 %1177 }
 0x401   : > { %v1179_v32 = vsub.f32 %v1175_v7, %v1178_v31 }
 0x403   : > { %v1180_v33 = vmul.f32 1.442695, %v1179_v32 }
 0x405   : > { %2503 = vpow2.f32 %v1180_v33 }
 0x40f   : > { %v2504_v34 = vpop.eup %2503 }
 0x410   : > { %v1182_v35 = vsel %vm1122_vm5, %v2504_v34, 0.0 }
 0x411   : > { %1183 = vadd.xlane.f32.xlu0 %v1182_v35 }
 0x473   : > { %v1293_v36 = vpop.xlane.xlu0 %1292 }
 0x474   : > { %v1294_v37 = vsub.f32 %v1290_v14, %v1293_v36 }
 0x476   : > { %v1295_v38 = vmul.f32 1.442695, %v1294_v37  ;;  %v2213_v37 = vld [vmem:[%s3330_s29] ss:$0 sm:$0xff] }
 0x478   : > { %2505 = vpow2.f32 %v1295_v38 }
 0x47b   : > { %v1414_v39 = vpop.xlane.xlu1 %1413 }
 0x47c   : > { %v1415_v40 = vsub.f32 %v1411_v20, %v1414_v39 }
 0x47e   : > { %v1416_v41 = vmul.f32 1.442695, %v1415_v40 }
 0x480   : > { %2507 = vpow2.f32 %v1416_v41 }
 0x482   : > { %v2506_v42 = vpop.eup %2505 }
 0x483   : > { %v1297_v43 = vsel %vm1122_vm5, %v2506_v42, 0.0  ;;  %v1534_v47 = vpop.xlane.xlu1 %1533 }
 0x484   : > { %1298 = vadd.xlane.f32.xlu1 %v1297_v43  ;;  %v1535_v48 = vsub.f32 %v1531_v26, %v1534_v47  ;;  %v2487_v26 = vld [vmem:[%s3328_s21] sm:$0xff]  }
 0x485   : > { %2359 = vmatpush3.bf16.msra.mxu1 %v2487_v26 }
 0x486   : > { %v1536_v49 = vmul.f32 1.442695, %v1535_v48  ;;  %2360 = vmatprep.subr.bf16.mxu1 %v2656_v9 }
 0x489   : > { %2361 = vmatpush3.bf16.msra.mxu1 %v2488_v27  ;;  %v2223_v27 = vld [vmem:[%s876_s19] ss:$0 sm:$0xff] }
 0x48a   : > { %v2508_v44 = vpop.eup %2507  ;;  %2374 = vmatprep.subr.bf16.mxu1 %v2656_v9 }
 0x48b   : > { %v1418_v45 = vsel %vm1122_vm5, %v2508_v44, 0.0 }
 0x48c   : > { %1419 = vadd.xlane.f32.xlu0 %v1418_v45 }
 0x495   : > { %1424 = vrot.lane.b32.xlu1 %v3043_v50, %s2658_s27 }
 0x49e   : > { %v1184_v46 = vpop.xlane.xlu0 %1183 }
 0x49f   : > { %2509 = vrcp.f32 %v1184_v46 }
 0x4a0   : > { %2511 = vpow2.f32 %v1536_v49 }
 0x4a2   : > { %1304 = vrot.lane.b32.xlu0 %v3043_v50, %s2659_s16  ;;  %s3331_s16 = scalar_lea.vmem %s3238_s12, %s2899_s2 }
 0x4a9   : > { %v2510_v51 = vpop.eup %2509 }
 0x4aa   : > { %v1186_v52 = vmul.f32 %v2510_v51, %v2504_v34  ;;  %v2512_v54 = vpop.eup %2511  ;;  %v2489_v51 = vld [vmem:[%s2961_s20] sm:$0xff]  }
 0x4ab   : > { %v1538_v55 = vsel %vm1122_vm5, %v2512_v54, 0.0 }
 0x4ac   : > { %v1187_v53 = vpack.c.bf16 %v1186_v52, %v1186_v52  ;;  %v2490_v52 = vld [vmem:[%s2961_s20 + $0x8] sm:$0xff]  }
 0x4ae   : > { %2319 = vmatmul.mubr.msk.bf16.vlgmr.msra.gmra.mrb[12].mxu0 %vm1122_vm5, %v1187_v53 }
 0x4af   : > { %2330 = vmatprep.mubr.msk.bf16.mxu0 %vm2657_vm2, %v2656_v9 }
 0x4b9   : > { %1539 = vadd.xlane.f32.xlu1 %v1538_v55 }
 0x4ca   : > { %1544 = vrot.lane.b32.xlu1 %v3043_v50, %s2660_s5 }
 0x511   : > { %v1299_v56 = vpop.xlane.xlu1 %1298 }
 0x512   : > { %2513 = vrcp.f32 %v1299_v56 }
 0x515   : > { %v1425_v62 = vpop.permute.xlu1 %1424 }
 0x516   : > { %v1430_v0 = vsel %vm1191_vm6, %v1425_v62, 0 }
 0x519   : > { %v1420_v57 = vpop.xlane.xlu0 %1419 }
 0x51a   : > { %2515 = vrcp.f32 %v1420_v57 }
 0x51c   : > { %v2514_v58 = vpop.eup %2513 }
 0x51d   : > { %v1301_v59 = vmul.f32 %v2514_v58, %v2506_v42  ;;  %v1305_v60 = vpop.permute.xlu0 %1304 }
 0x51e   : > { %v1310_v61 = vsel %vm1191_vm6, %v1305_v60, 0 }
 0x51f   : > { %2329 = vmatpush3.bf16.msra.mxu0 %v1310_v61  ;;  %v1302_v63 = vpack.c.bf16 %v1301_v59, %v1301_v59  ;;  %v2217_v61 = vld [vmem:[%s3331_s16] ss:$0 sm:$0xff] }
 0x520   : > { %2340 = vmatprep.subr.bf16.mxu0 %v2656_v9 }
 0x522   : > { %2331 = vmatmul.mubr.msk.bf16.vlgmr.msra.gmra.mrb[16].mxu0 %vm1122_vm5, %v1302_v63 }
 0x523   : > { %2341 = vmatpush3.bf16.msra.mxu0 %v1430_v0  ;;  %2342 = vmatprep.mubr.msk.bf16.mxu0 %vm2657_vm2, %v2656_v9  ;;  %v2218_v0 = vld [vmem:[%s860_s13] ss:$0 sm:$0xff] }
 0x524   : > { %v2516_v50 = vpop.eup %2515  ;;  %2352 = vmatprep.subr.bf16.mxu0 %v2656_v9 }
 0x525   : > { %v1422_v2 = vmul.f32 %v2516_v50, %v2508_v44 }
 0x527   : > { %v1423_v3 = vpack.c.bf16 %v1422_v2, %v1422_v2 }
 0x52a   : > { %2343 = vmatmul.mubr.msk.bf16.vlgmr.msra.gmra.mrb[20].mxu0 %vm1122_vm5, %v1423_v3 }
 0x52b   : > { %2354 = vmatprep.mubr.msk.bf16.mxu0 %vm2657_vm2, %v2656_v9 }
 0x546   : > { %v1540_v4 = vpop.xlane.xlu1 %1539 }
 0x547   : > { %2517 = vrcp.f32 %v1540_v4  ;;  %v2492_v4 = vld [vmem:[%s2971_s11 + $0x8] sm:$0xff]  }
 0x54a   : > { %v1545_v5 = vpop.permute.xlu1 %1544 }
 0x54b   : > { %v1550_v6 = vsel %vm1191_vm6, %v1545_v5, 0  ;;  %v2493_v5 = vld [vmem:[%s2971_s11 + $0x10] sm:$0xff]  }
 0x54c   : > { %2353 = vmatpush3.bf16.msra.mxu0 %v1550_v6  ;;  %v2494_v6 = vld [vmem:[%s2971_s11 + $0x18] sm:$0xff]  }
 0x54d   : > { %2366 = vmatprep.subr.bf16.mxu0 %v2656_v9 }
 0x551   : > { %v2518_v7 = vpop.eup %2517 }
 0x552   : > { %v1542_v8 = vmul.f32 %v2518_v7, %v2512_v54  ;;  %v2495_v7 = vld [vmem:[%s2971_s11 + $0x20] sm:$0xff]  }
 0x554   : > { %v1543_v10 = vpack.c.bf16 %v1542_v8, %v1542_v8  ;;  %v2496_v8 = vld [vmem:[%s2971_s11 + $0x28] sm:$0xff]  }
 0x556   : > { %2355 = vmatmul.mubr.msk.bf16.vlgmr.msra.gmra.mrb[24].mxu0 %vm1122_vm5, %v1543_v10  ;;  %v2497_v10 = vld [vmem:[%s2971_s11 + $0x30] sm:$0xff]  }
 0x557   : > { %2370 = vmatprep.mubr.msk.bf16.mxu0 %vm2657_vm2, %v2656_v9  ;;  %2367 = vmatpush3.bf16.msra.mxu0 %v2489_v51 }
 0x558   : > { %2368 = vmatprep.subr.bf16.mxu0 %v2656_v9 }
 0x55b   : > { %2369 = vmatpush3.bf16.msra.mxu0 %v2490_v52 }
 0x581   : > { %v1229_v11 = vpop.f32.mrb[12].mxu0 }
 0x582   : > { %v1235_v12 = vpack.c.bf16 %v1229_v11, %v1229_v11  ;;  %v2320_v13 = vpop.f32.mrb[13].mxu0  ;;  %v2498_v11 = vld [vmem:[%s2971_s11 + $0x38] sm:$0xff]  }
 0x583   : > { %v1232_v14 = vpop.f32.mrb[14].mxu0 }
 0x584   : > { %1237 = vst.msk [vmem:[#allocation3] sm:$0xf] %vm1236_vm9, %v1235_v12  ;;  %v2321_v15 = vpop.f32.mrb[15].mxu0  ;;  %v2219_v12 = vld [vmem:[%s868_s4] ss:$0 sm:$0xff] }
 0x5f5   : > { %v1346_v16 = vpop.f32.mrb[16].mxu0 }
 0x5f6   : > { %v2243_v17 = vpack.c.bf16 %v1346_v16, %v1346_v16  ;;  %v2332_v18 = vpop.f32.mrb[17].mxu0 }
 0x5f7   : > { %v1349_v19 = vpop.f32.mrb[18].mxu0 }
 0x5f8   : > { %1356 = vrot.lane.b32.xlu0 %v2243_v17, %s2662_s15  ;;  %v2333_v20 = vpop.f32.mrb[19].mxu0 }
 0x5fd   : > { %v1466_v21 = vpop.f32.mrb[20].mxu0 }
 0x5fe   : > { %v2244_v22 = vpack.c.bf16 %v1466_v21, %v1466_v21  ;;  %v2344_v23 = vpop.f32.mrb[21].mxu0 }
 0x5ff   : > { %v1469_v24 = vpop.f32.mrb[22].mxu0 }
 0x600   : > { %1476 = vrot.lane.b32.xlu1 %v2244_v22, %s2663_s18  ;;  %v2345_v25 = vpop.f32.mrb[23].mxu0 }
 0x629   : > { %v1586_v28 = vpop.f32.mrb[24].mxu0 }
 0x62a   : > { %v2245_v29 = vpack.c.bf16 %v1586_v28, %v1586_v28  ;;  %v2356_v30 = vpop.f32.mrb[25].mxu0 }
 0x62b   : > { %v1589_v31 = vpop.f32.mrb[26].mxu0 }
 0x62c   : > { %1596 = vrot.lane.b32.xlu0 %v2245_v29, %s2664_s14  ;;  %v2357_v32 = vpop.f32.mrb[27].mxu0 }
 0x66a   : > { %v1357_v33 = vpop.permute.xlu0 %1356 }
 0x66b   : > { %1360 = vst.msk [vmem:[#allocation3] sm:$0xf] %vm1359_vm10, %v1357_v33 }
 0x672   : > { %v1477_v34 = vpop.permute.xlu1 %1476 }
 0x673   : > { %1480 = vst.msk [vmem:[#allocation3] sm:$0xf] %vm1479_vm11, %v1477_v34 }
 0x69e   : > { %v1597_v35 = vpop.permute.xlu0 %1596 }
 0x69f   : > { %1600 = vst.msk [vmem:[#allocation3] sm:$0xf] %vm1599_vm12, %v1597_v35 }
 0x6a6   : > { %v1601_v36 = vld [vmem:[#allocation3] sm:$0xf] }
 0x6a7   : > { %2363 = vmatmul.mubr.msk.bf16.vlgmr.msra.gmra.mrb[16].mxu1 %vm890_vm1, %v1601_v36 }
 0x6a8   : > { %2390 = vmatprep.mubr.msk.bf16.mxu1 %vm2657_vm2, %v2656_v9 }
 0x77a   : > { %v1662_v38 = vpop.f32.mrb[16].mxu1 }
 0x77b   : > { %v1663_v39 = vadd.f32 %v2213_v37, %v1662_v38  ;;  %v2364_v40 = vpop.f32.mrb[17].mxu1 }
 0x77c   : > { %v1665_v41 = vpop.f32.mrb[18].mxu1 }
 0x77d   : > { %v3123_v42 = vadd.f32 %v1663_v39, %v2980_v1  ;;  %v2365_v43 = vpop.f32.mrb[19].mxu1  ;;  %v2491_v1 = vld [vmem:[%s2971_s11] sm:$0xff]  }
 0x77e   : > { %2375 = vmatpush3.bf16.msra.mxu1 %v2491_v1 }
 0x77f   : > { %v1671_v44 = vsel %vm890_vm1, %v3123_v42, 0.0  ;;  %2376 = vmatprep.subr.bf16.mxu1 %v2656_v9 }
 0x780   : > { %1672 = vadd.xlane.f32.xlu1 %v1671_v44 }
 0x782   : > { %2377 = vmatpush3.bf16.msra.mxu1 %v2492_v4 }
 0x783   : > { %2378 = vmatprep.subr.bf16.mxu1 %v2656_v9 }
 0x786   : > { %2379 = vmatpush3.bf16.msra.mxu1 %v2493_v5 }
 0x787   : > { %2380 = vmatprep.subr.bf16.mxu1 %v2656_v9 }
 0x78a   : > { %2381 = vmatpush3.bf16.msra.mxu1 %v2494_v6 }
 0x78b   : > { %2382 = vmatprep.subr.bf16.mxu1 %v2656_v9 }
 0x78e   : > { %2383 = vmatpush3.bf16.msra.mxu1 %v2495_v7 }
 0x78f   : > { %2384 = vmatprep.subr.bf16.mxu1 %v2656_v9 }
 0x792   : > { %2385 = vmatpush3.bf16.msra.mxu1 %v2496_v8 }
 0x793   : > { %2386 = vmatprep.subr.bf16.mxu1 %v2656_v9 }
 0x796   : > { %2387 = vmatpush3.bf16.msra.mxu1 %v2497_v10 }
 0x797   : > { %2388 = vmatprep.subr.bf16.mxu1 %v2656_v9 }
 0x79a   : > { %2389 = vmatpush3.bf16.msra.mxu1 %v2498_v11 }
 0x80d   : > { %v1673_v45 = vpop.xlane.xlu1 %1672 }
 0x80e   : > { %v1674_v46 = vmul.f32 0.03125, %v1673_v45 }
 0x810   : > { %v1675_v47 = vsub.f32 %v3123_v42, %v1674_v46 }
 0x812   : > { %v1676_v48 = vmul.f32 %v1675_v47, %v1675_v47  ;;  %v1696_v62 = vmul.f32 %v2217_v61, %v1675_v47 }
 0x814   : > { %v1677_v49 = vsel %vm890_vm1, %v1676_v48, 0.0 }
 0x815   : > { %1678 = vadd.xlane.f32.xlu0 %v1677_v49 }
 0x8a2   : > { %v1679_v53 = vpop.xlane.xlu0 %1678 }
 0x8a3   : > { %v1680_v54 = vmul.f32 0.032258064, %v1679_v53 }
 0x8a5   : > { %2519 = vrsqrt.f32 %v1680_v54  ;;  %vm1683_vm13 = vcmp.eq.f32.partialorder %v1680_v54, inf  ;;  %v1686_v57 = vand.u32 2147483648, %v1680_v54  ;;  %vm1685_vm14 = vcmp.eq.f32.partialorder %v1680_v54, 0.0 }
 0x8af   : > { %v2520_v55 = vpop.eup %2519 }
 0x8b0   : > { %v1682_v56 = vmul.f32 %v2520_v55, %v1680_v54 }
 0x8b2   : > { %v1684_v58 = vsel %vm1683_vm13, %v1680_v54, %v1682_v56 }
 0x8b3   : > { %v1687_v59 = vsel %vm1685_vm14, %v1686_v57, %v1684_v58 }
 0x8b4   : > { %v1688_v60 = vadd.f32 1e-06, %v1687_v59 }
 0x8b6   : > { %2521 = vrcp.f32 %v1688_v60 }
 0x8c0   : > { %v2522_v63 = vpop.eup %2521 }
 0x8c1   : > { %v1697_v50 = vmul.f32 %v2522_v63, %v1696_v62 }
 0x8c3   : > { %v1704_v2 = vadd.f32 %v2218_v0, %v1697_v50 }
 0x8c5   : > { %v1705_v3 = vpack.c.bf16 %v1704_v2, %v1704_v2 }
 0x8c7   : > { %2371 = vmatmul.mubr.msk.bf16.vlgmr.msra.gmra.mrb[28].mxu0 %vm890_vm1, %v1705_v3 }
 0x99a   : > { %v1766_v13 = vpop.f32.mrb[28].mxu0 }
 0x99b   : > { %v1767_v14 = vadd.f32 %v2219_v12, %v1766_v13  ;;  %v2372_v15 = vpop.f32.mrb[29].mxu0 }
 0x99c   : > { %v1769_v16 = vpop.f32.mrb[30].mxu0 }
 0x99d   : > { %v1773_v17 = vmul.f32 %v1767_v14, %v1767_v14  ;;  %v2373_v18 = vpop.f32.mrb[31].mxu0  ;;  %v1772_v9 = vmul.f32 0.5, %v1767_v14 }
 0x99f   : > { %v1774_v19 = vmul.f32 %v1773_v17, %v1767_v14 }
 0x9a1   : > { %v1775_v20 = vmul.f32 0.044715, %v1774_v19 }
 0x9a3   : > { %v1776_v21 = vadd.f32 %v1775_v20, %v1767_v14 }
 0x9a5   : > { %v1777_v22 = vmul.f32 0.7978846, %v1776_v21 }
 0x9a7   : > { %2523 = vtanh.f32 %v1777_v22 }
 0x9b1   : > { %v2524_v23 = vpop.eup %2523 }
 0x9b2   : > { %v1779_v24 = vadd.f32 1.0, %v2524_v23 }
 0x9b4   : > { %v1780_v25 = vmul.f32 %v1779_v24, %v1772_v9 }
 0x9b6   : > { %v1781_v26 = vpack.c.bf16 %v1780_v25, %v1780_v25 }
 0x9b8   : > { %2391 = vmatmul.mubr.bf16.vlgmr.msra.gmra.mrb[20].mxu1 %v1781_v26 }
 0xa8a   : > { %1898 = sbr.rel (%p2232_p0) target bundleno = 2705 (0xa91), region = 104 }
 0xa8b   : > { %v1887_v28 = vpop.f32.mrb[20].mxu1 }
 0xa8c   : > { %v1888_v29 = vadd.f32 %v2223_v27, %v1887_v28  ;;  %v2392_v30 = vpop.f32.mrb[21].mxu1 }
 0xa8d   : > { %v1890_v31 = vpop.f32.mrb[22].mxu1 }
 0xa8e   : > { %v1893_v32 = vadd.f32 %v1888_v29, %v3123_v42  ;;  %v2393_v33 = vpop.f32.mrb[23].mxu1 }
 0xa90   : > { %1894 = vst.msk [vmem:[#allocation2] sm:$0xff] %vm890_vm1, %v1893_v32  ;;  %1899 = vst.msk [vmem:[%s2977_s8] sm:$0xff] (!%p2232_p0), %vm890_vm1, %v1893_v32 }
 0xa91 PF: > { %s3335_s9 = sld [smem:[#allocation13_spill]]  ;;  %s3336_s2 = sld [smem:[#allocation22_spill]] }
 0xa92   : > { %s3337_s19 = sld [smem:[#allocation19_spill]]  ;;  %s3338_s21 = sld [smem:[#allocation40_spill]] }
 0xa93   : > { %s1914_s18 = sshll.u32 %s2977_s8, 4  ;;  %s2665_s30 = smov [#allocation7]   ;;  %s1915_s18 = int_to_ptr.vmem [resolvable:$true] %s1914_s18 }
 0xa94   : > { %s2555_s1 = scalar_lea.vmem %s1915_s18, 128  ;;  %s2559_s22 = sshll.u32 %s2665_s30, 4  ;;  %s2560_s22 = int_to_ptr.vmem [resolvable:$false] %s2559_s22 }
 0xa95   : > { %p2556_p7 = scmp.ne.s32.totalorder %s1915_s18, %s2555_s1  ;;  %s2561_s28 = scalar_lea.vmem %s2560_s22, 256 }
 0xa96   : > { %p2562_p3 = scmp.lt.s32.totalorder %s1915_s18, %s2560_s22  ;;  %p2563_p8 = scmp.lt.s32.totalorder %s2561_s28, %s2555_s1 }
 0xa97   : > { %s2234_s10 = sshll.u32 %s3335_s9, 7  ;;  %s1901_s14 = scalar_lea.sflag [#allocation6], %s3336_s2 }
 0xa98   : > { %s3177_s15 = scalar_lea.hbm %s3338_s21, %s2234_s10  ;;  %p3339_p13 = scmp.ne.s32.totalorder %s3337_s19, 0 }
 0xa99   : > { %p2564_p12 = por %p2563_p8, %p2562_p3 }
 0xa9a   : > { %p2557_p4 = pnand %p2556_p7, %p3339_p13 }
 0xa9c   : > { %p2558_p6 = pneg %p2557_p4 }
 0xa9e   : > { %p2565_p1 = pnand %p2564_p12, %p2558_p6 }
 0xaa0   : > { %2568 = shalt.err (!%p2565_p1)
}
 0xaa1   : > { %s2569_s8 = scalar_lea.hbm %s3177_s15, 128  ;;  %s2573_s27 = scalar_lea.hbm %s3338_s21, 256 }
 0xaa2   : > { %p2570_p2 = scmp.ne.s32.totalorder %s3177_s15, %s2569_s8  ;;  %p2574_p11 = scmp.lt.u32.totalorder %s3177_s15, %s3338_s21 }
 0xaa3   : > { %p2575_p9 = scmp.lt.u32.totalorder %s2573_s27, %s2569_s8  ;;  %p2577_p7 = scmp.lt.u32.totalorder %s2569_s8, %s3177_s15 }
 0xaa4   : > { %p2571_p5 = pnand %p2570_p2, %p3339_p13 }
 0xaa5   : > { %p2576_p0 = por %p2575_p9, %p2574_p11 }
 0xaa6   : > { %p2572_p10 = pneg %p2571_p5 }
 0xaa7   : > { %p2578_p4 = por %p2577_p7, %p2576_p0 }
 0xaa9   : > { %p2579_p6 = pnand %p2578_p4, %p2572_p10 }
 0xaab   : > { %2582 = shalt.err (!%p2579_p6)
}
 0xaac   : > { %2396 = dma.vmem_to_hbm [thread:$0]  (%p3339_p13), %s1915_s18, 128, %s3177_s15, %s1901_s14  }
 0xaad PF: > { %s3340_s17 = sld [smem:[#allocation16_spill]]  ;;  %s3341_s24 = sld [smem:[#allocation10_spill]] }
 0xaae   : > { %s3342_s13 = sld [smem:[#allocation20_spill]] }
 0xab3   : > { %p2407_p3 = scmp.ge.s32.totalorder %s3340_s17, 2  ;;  %s1926_s25 = sand.u32 1, %s3341_s24  }
 0xab4   : > { %p3343_p8 = scmp.ne.s32.totalorder %s3342_s13, 0  ;;  %s1927_s5 = scalar_lea.sflag [#allocation6], %s1926_s25 }
 0xab6   : > { %p2403_p12 = pnand %p2407_p3, %p3343_p8 }
 0xab8   : > { %2620 = dma.done.wait (!%p2403_p12), %s1927_s5, 128  }
 0xab9   : > { %2622 = vsyncadd (!%p2403_p12), %s1927_s5, 4294967168  ;;  %s34_s20 = sadd.s32 1, %s3340_s17   ;;  %s3344_s27 = sld [smem:[#allocation11_spill]] }
 0xaba   : > { %p31_p1 = scmp.ge.s32.totalorder %s34_s20, 6   ;;  %s3345_s28 = sld [smem:[#allocation12_spill]] }
 0xabb   : > { %s3346_s29 = sld [smem:[#allocation21_spill]]  ;;  %s3347_s30 = sld [smem:[#allocation14_spill]] }
 0xabc   : > { %s3348_s0 = sld [smem:[#allocation15_spill]]  ;;  %s3349_s19 = sld [smem:[#allocation17_spill]] }
 0xabd   : > { %s3350_s1 = sld [smem:[#allocation18_spill]]  ;;  %33 = sbr.rel (!%p31_p1) target bundleno = 24 (0x18), region = 196 }
 0xac4   :  { %1932 = vsyncpa [#allocation5], 1 }
 0xac5   :  { %1934 = vsyncpa [#allocation5 + $0x1], 1 }
 0xac6   :  { %1935 = vsyncpa [#allocation6], 1 }
 0xac7   :  { %1937 = vsyncpa [#allocation6 + $0x1], 1 }

</bundles_post_ra>
